<compile_context>
chip_gen: v6e
topology: v6e:2x2x1
jax: 0.10.0
libtpu: 0.0.40
codegen_flags: <defaults>
</compile_context>

<pallas_src>
import jax
import jax.numpy as jnp
from jax import lax
from jax.experimental import pallas as pl
from jax.experimental.pallas import tpu as pltpu


def _round_up(x, m):
    return ((x + m - 1) // m) * m


def make_dae_kernel(sub_tile, n_sub, n_hidden):
    """Build the fused Linear+ReLU kernel.

    n_hidden = number of layers whose output width is the padded hidden width H
    (all layers except the last).  Compute runs over `n_sub` sub-tiles of
    `sub_tile` rows each so live f32 intermediates stay within the 64-vreg file
    while the DMA tile (batch_tile = n_sub * sub_tile rows) stays large.
    """

    def kernel(x_ref, w_first_ref, w_mid_ref, w_last_ref, b_hid_ref, b_last_ref,
               o_ref):
        def sub_body(s, carry):
            r = pl.multiple_of(s * sub_tile, sub_tile)
            h = x_ref[pl.ds(r, sub_tile), :]                        # bf16 (sub, in_c)
            # hidden layers 1..n_hidden (output widths padded to H lanes; padding
            # is exact: zero weight cols + zero bias stay zero through ReLU)
            for l in range(n_hidden):
                w = w_first_ref[...] if l == 0 else w_mid_ref[l - 1]
                z = jnp.dot(h, w, preferred_element_type=jnp.float32)   # MXU, f32 acc
                z = jnp.maximum(z + b_hid_ref[pl.ds(l, 1), :], 0.0)     # f32 VPU epilogue
                h = z.astype(jnp.bfloat16)                              # feed next matmul
            # final layer: output width == in_c exactly (no padding, no dead cast)
            z = jnp.dot(h, w_last_ref[...], preferred_element_type=jnp.float32)
            z = jnp.maximum(z + b_last_ref[...], 0.0)
            o_ref[pl.ds(r, sub_tile), :] = z.astype(o_ref.dtype)
            return carry

        if n_sub == 1:
            sub_body(0, 0)
        else:
            # fori_loop bounds live ranges per sub-tile (prevents vreg spill).
            lax.fori_loop(0, n_sub, sub_body, 0)

    return kernel


def pack_dae_params(params, lane=128):
    """Pad/stack the (W, b) pairs into 5 lane-aligned arrays.

    All intermediate widths are zero-padded to a common H = round_up(max_hidden, 128).
    Zero padding is exact (zero weight rows/cols + zero bias + ReLU keep padded
    lanes at 0).  Weights go to bf16 for the MXU; biases stay f32.
    """
    assert len(params) >= 3
    in_c = int(params[0][0].shape[0])
    out_c = int(params[-1][0].shape[1])
    hmax = max(int(w.shape[1]) for w, _ in params[:-1])
    H = max(lane, _round_up(hmax, lane))

    w0, _ = params[0]
    w_first = jnp.zeros((in_c, H), jnp.bfloat16)
    w_first = w_first.at[:, : w0.shape[1]].set(w0.astype(jnp.bfloat16))

    n_mid = len(params) - 2
    w_mid = jnp.zeros((n_mid, H, H), jnp.bfloat16)
    for l, (w, _) in enumerate(params[1:-1]):
        w_mid = w_mid.at[l, : w.shape[0], : w.shape[1]].set(w.astype(jnp.bfloat16))

    wN, bN = params[-1]
    w_last = jnp.zeros((H, out_c), jnp.bfloat16)
    w_last = w_last.at[: wN.shape[0], :].set(wN.astype(jnp.bfloat16))

    n_hidden = len(params) - 1
    b_hid = jnp.zeros((_round_up(n_hidden, 8), H), jnp.float32)   # sublane-aligned rows
    for l, (_, b) in enumerate(params[:-1]):
        b_hid = b_hid.at[l, : b.shape[1]].set(b.reshape(-1).astype(jnp.float32))

    b_last = bN.reshape(1, out_c).astype(jnp.float32)
    return w_first, w_mid, w_last, b_hid, b_last, H


def _choose_tiles(B, batch_tile=512, sub_base=256):
    """Pick (batch_tile, sub_tile, B_pad) for a batch of B rows.

    Small/ragged batches: clamp the tile to round_up(B, 16) (minimal padding).
    Large batches: big tiles for big DMAs, but keep >= 2 grid steps when
    possible so both v7x TensorCores get work on the 'parallel' batch axis.
    """
    if B <= sub_base:
        bt = max(16, _round_up(B, 16))
        return bt, bt, bt
    bt = min(_round_up(batch_tile, sub_base), _round_up(B, sub_base))
    if _round_up(B, bt) // bt < 2 and bt > sub_base:
        bt = max(sub_base, _round_up(pl.cdiv(B, 2), sub_base))
    return bt, sub_base, _round_up(B, bt)


def dae_forward(x, params, *, batch_tile=512, sub_base=256, lane=128):
    """x: (B, in_c) float32.  params: list of (W, b) pairs, W=(in,out) f32, b=(1,out) f32.

    Returns (B, in_c) float32.
    """
    B, in_c = x.shape
    w_first, w_mid, w_last, b_hid, b_last, H = pack_dae_params(params, lane=lane)
    out_c = int(w_last.shape[1])

    bt, sub, B_pad = _choose_tiles(B, batch_tile, sub_base)
    n_sub = bt // sub
    grid = (B_pad // bt,)

    # bf16 input halves the kernel's input HBM stream (the MXU consumes bf16 anyway).
    xb = x.astype(jnp.bfloat16)
    if B_pad != B:
        xb = jnp.pad(xb, ((0, B_pad - B), (0, 0)))

    kernel = make_dae_kernel(sub_tile=sub, n_sub=n_sub, n_hidden=len(params) - 1)

    const2 = lambda i: (0, 0)
    in_specs = [
        pl.BlockSpec((bt, in_c), lambda i: (i, 0)),          # x: batch-tiled
        pl.BlockSpec(w_first.shape, const2),                 # params: constant maps ->
        pl.BlockSpec(w_mid.shape, lambda i: (0, 0, 0)),      # DMA'd once, VMEM-resident
        pl.BlockSpec(w_last.shape, const2),
        pl.BlockSpec(b_hid.shape, const2),
        pl.BlockSpec(b_last.shape, const2),
    ]
    out_spec = pl.BlockSpec((bt, out_c), lambda i: (i, 0))   # unpadded f32 output

    # --- VMEM budget: actual need + margin (no artificial floor) -------------
    param_bytes = sum(int(a.size) * a.dtype.itemsize
                      for a in (w_first, w_mid, w_last, b_hid, b_last))
    x_tile_bytes = bt * in_c * 2
    out_tile_bytes = bt * out_c * 4
    interm_bytes = 4 * sub * H * 4                 # live f32/bf16 sub-tile intermediates
    vmem_need = (2 * x_tile_bytes + 2 * out_tile_bytes   # double-buffered x / out tiles
                 + 2 * param_bytes                       # params (worst case 2 buffers)
                 + interm_bytes)
    vmem_limit = int(min(vmem_need + (8 << 20), 64 << 20))  # stay under v7x physical VMEM

    # True (unpadded) FLOPs; bytes = bf16 input + f32 output + params.
    flops = 2 * B * sum(int(w.shape[0]) * int(w.shape[1]) for w, _ in params)
    bytes_accessed = B_pad * in_c * 2 + B_pad * out_c * 4 + param_bytes
    cost = pl.CostEstimate(flops=flops, transcendentals=0,
                           bytes_accessed=bytes_accessed)

    out = pl.pallas_call(
        kernel,
        out_shape=jax.ShapeDtypeStruct((B_pad, out_c), jnp.float32),
        grid_spec=pltpu.PrefetchScalarGridSpec(
            num_scalar_prefetch=0,
            grid=grid,
            in_specs=in_specs,
            out_specs=out_spec,
        ),
        compiler_params=pltpu.CompilerParams(
            dimension_semantics=("parallel",),     # batch tiles shard across TCs
            vmem_limit_bytes=vmem_limit,
        ),
        cost_estimate=cost,
    )(xb, w_first, w_mid, w_last, b_hid, b_last)

    # Only slice when the batch was actually padded (no extra pass otherwise).
    return out if B_pad == B else out[:B]


def init_dae_params(key, in_channels):
    """Deterministic synthetic parameters matching the module's layer shapes."""
    dims = []
    for i in range(3):                                # encoder
        dims.append((in_channels // (2 ** i), in_channels // (2 ** (i + 1))))
    for i in range(3, 0, -1):                         # decoder
        dims.append((in_channels // (2 ** i), in_channels // (2 ** (i - 1))))

    params = []
    for (d_in, d_out) in dims:
        key, kw, kb = jax.random.split(key, 3)
        bound = 1.0 / jnp.sqrt(jnp.float32(d_in))
        w = jax.random.uniform(kw, (d_in, d_out), jnp.float32, -bound, bound)
        b = jax.random.uniform(kb, (1, d_out), jnp.float32, -bound, bound)
        params.append((w, b))
    return params


def dae_reference(x, params):
    """Reference with the same numerics as the kernel (bf16 matmul, f32 epilogue)."""
    h = x.astype(jnp.bfloat16)
    z = None
    for w, b in params:
        z = jnp.dot(h, w.astype(jnp.bfloat16), preferred_element_type=jnp.float32)
        z = jnp.maximum(z + b.astype(jnp.float32), 0.0)
        h = z.astype(jnp.bfloat16)
    return z


if __name__ == "__main__":
    key = jax.random.PRNGKey(0)
    in_channels = 64      # must be divisible by 8 (three halvings in the encoder)
    batch = 1024          # -> batch_tile=512, grid=2 (both v7x TCs), 2 inner sub-tiles

    kx, kp = jax.random.split(key)
    x = jax.random.normal(kx, (batch, in_channels), jnp.float32)
    params = init_dae_params(kp, in_channels)

    out = jax.block_until_ready(dae_forward(x, params))
    ref = dae_reference(x, params)
    assert out.shape == (batch, in_channels)
    assert out.dtype == jnp.float32
    assert jnp.allclose(out, ref, atol=1e-2, rtol=1e-2)

    # Ragged / small-batch path: tile clamps to 48 rows (round_up(40,16)), 1 grid step.
    x_small = x[:40]
    out_small = jax.block_until_ready(dae_forward(x_small, params))
    assert out_small.shape == (40, in_channels)
    assert jnp.allclose(out_small, ref[:40], atol=1e-2, rtol=1e-2)

    print("KERNEL_OK")
</pallas_src>

<mosaic_0001>
module attributes {stable_mosaic.version = 11 : i64} {
  func.func @kernel(%arg0: i32, %arg1: memref<512x64xbf16, #tpu.memory_space<vmem>>, %arg2: memref<64x128xbf16, #tpu.memory_space<vmem>>, %arg3: memref<4x128x128xbf16, #tpu.memory_space<vmem>>, %arg4: memref<128x64xbf16, #tpu.memory_space<vmem>>, %arg5: memref<8x128xf32, #tpu.memory_space<vmem>>, %arg6: memref<1x64xf32, #tpu.memory_space<vmem>>, %arg7: memref<512x64xf32, #tpu.memory_space<vmem>>) attributes {dimension_semantics = [#tpu.dimension_semantics<parallel>], iteration_bounds = array<i64: 2>, scalar_prefetch = 0 : i64, scratch_operands = 0 : i64, tpu.core_type = #tpu.core_type<tc>, window_params = [{transform_indices = @transform_0, window_bounds = array<i64: 512, 64>}, {pipeline_mode = #tpu.pipeline_mode<synchronous>, transform_indices = @transform_1, window_bounds = array<i64: 64, 128>}, {pipeline_mode = #tpu.pipeline_mode<synchronous>, transform_indices = @transform_2, window_bounds = array<i64: 4, 128, 128>}, {pipeline_mode = #tpu.pipeline_mode<synchronous>, transform_indices = @transform_3, window_bounds = array<i64: 128, 64>}, {pipeline_mode = #tpu.pipeline_mode<synchronous>, transform_indices = @transform_4, window_bounds = array<i64: 8, 128>}, {pipeline_mode = #tpu.pipeline_mode<synchronous>, transform_indices = @transform_5, window_bounds = array<i64: 1, 64>}, {transform_indices = @transform_6, window_bounds = array<i64: 512, 64>}]} {
    %c0_i32 = arith.constant 0 : i32
    %c2_i32 = arith.constant 2 : i32
    %0 = arith.addi %c0_i32, %c2_i32 : i32
    %c1_i32 = arith.constant 1 : i32
    scf.for %arg8 = %c0_i32 to %0 step %c1_i32  : i32 {
      %c256_i32 = arith.constant 256 : i32
      %1 = arith.muli %arg8, %c256_i32 : i32
      %2 = tpu.assume_multiple %1, 256 : i32
      %3 = arith.index_cast %2 : i32 to index
      %c0 = arith.constant 0 : index
      %4 = vector.load %arg1[%3, %c0] : memref<512x64xbf16, #tpu.memory_space<vmem>>, vector<256x64xbf16>
      %c0_1 = arith.constant 0 : index
      %c0_2 = arith.constant 0 : index
      %5 = vector.load %arg2[%c0_1, %c0_2] : memref<64x128xbf16, #tpu.memory_space<vmem>>, vector<64x128xbf16>
      %cst = arith.constant dense<0.000000e+00> : vector<256x128xf32>
      %6 = tpu.matmul %4, %5, %cst {dimension_numbers = #tpu.dot_dimension_numbers<[1], [0], [0], [1], [0, 0, 1, 1], [], []>} : vector<256x64xbf16>, vector<64x128xbf16>, vector<256x128xf32> -> vector<256x128xf32>
      %c0_3 = arith.constant 0 : index
      %c0_4 = arith.constant 0 : index
      %7 = vector.load %arg5[%c0_3, %c0_4] : memref<8x128xf32, #tpu.memory_space<vmem>>, vector<1x128xf32>
      %8 = vector.broadcast %7 : vector<1x128xf32> to vector<256x128xf32>
      %9 = arith.addf %6, %8 : vector<256x128xf32>
      %cst_5 = arith.constant 0.000000e+00 : f32
      %10 = vector.broadcast %cst_5 : f32 to vector<256x128xf32>
      %11 = arith.maximumf %9, %10 : vector<256x128xf32>
      %12 = arith.truncf %11 : vector<256x128xf32> to vector<256x128xbf16>
      %c0_6 = arith.constant 0 : index
      %c0_7 = arith.constant 0 : index
      %c0_8 = arith.constant 0 : index
      %13 = vector.load %arg3[%c0_6, %c0_7, %c0_8] : memref<4x128x128xbf16, #tpu.memory_space<vmem>>, vector<1x128x128xbf16>
      %14 = vector.shape_cast %13 : vector<1x128x128xbf16> to vector<128x128xbf16>
      %cst_9 = arith.constant dense<0.000000e+00> : vector<256x128xf32>
      %15 = tpu.matmul %12, %14, %cst_9 {dimension_numbers = #tpu.dot_dimension_numbers<[1], [0], [0], [1], [0, 0, 1, 1], [], []>} : vector<256x128xbf16>, vector<128x128xbf16>, vector<256x128xf32> -> vector<256x128xf32>
      %c1 = arith.constant 1 : index
      %c0_10 = arith.constant 0 : index
      %16 = vector.load %arg5[%c1, %c0_10] : memref<8x128xf32, #tpu.memory_space<vmem>>, vector<1x128xf32>
      %17 = vector.broadcast %16 : vector<1x128xf32> to vector<256x128xf32>
      %18 = arith.addf %15, %17 : vector<256x128xf32>
      %cst_11 = arith.constant 0.000000e+00 : f32
      %19 = vector.broadcast %cst_11 : f32 to vector<256x128xf32>
      %20 = arith.maximumf %18, %19 : vector<256x128xf32>
      %21 = arith.truncf %20 : vector<256x128xf32> to vector<256x128xbf16>
      %c1_12 = arith.constant 1 : index
      %c0_13 = arith.constant 0 : index
      %c0_14 = arith.constant 0 : index
      %22 = vector.load %arg3[%c1_12, %c0_13, %c0_14] : memref<4x128x128xbf16, #tpu.memory_space<vmem>>, vector<1x128x128xbf16>
      %23 = vector.shape_cast %22 : vector<1x128x128xbf16> to vector<128x128xbf16>
      %cst_15 = arith.constant dense<0.000000e+00> : vector<256x128xf32>
      %24 = tpu.matmul %21, %23, %cst_15 {dimension_numbers = #tpu.dot_dimension_numbers<[1], [0], [0], [1], [0, 0, 1, 1], [], []>} : vector<256x128xbf16>, vector<128x128xbf16>, vector<256x128xf32> -> vector<256x128xf32>
      %c2 = arith.constant 2 : index
      %c0_16 = arith.constant 0 : index
      %25 = vector.load %arg5[%c2, %c0_16] : memref<8x128xf32, #tpu.memory_space<vmem>>, vector<1x128xf32>
      %26 = vector.broadcast %25 : vector<1x128xf32> to vector<256x128xf32>
      %27 = arith.addf %24, %26 : vector<256x128xf32>
      %cst_17 = arith.constant 0.000000e+00 : f32
      %28 = vector.broadcast %cst_17 : f32 to vector<256x128xf32>
      %29 = arith.maximumf %27, %28 : vector<256x128xf32>
      %30 = arith.truncf %29 : vector<256x128xf32> to vector<256x128xbf16>
      %c2_18 = arith.constant 2 : index
      %c0_19 = arith.constant 0 : index
      %c0_20 = arith.constant 0 : index
      %31 = vector.load %arg3[%c2_18, %c0_19, %c0_20] : memref<4x128x128xbf16, #tpu.memory_space<vmem>>, vector<1x128x128xbf16>
      %32 = vector.shape_cast %31 : vector<1x128x128xbf16> to vector<128x128xbf16>
      %cst_21 = arith.constant dense<0.000000e+00> : vector<256x128xf32>
      %33 = tpu.matmul %30, %32, %cst_21 {dimension_numbers = #tpu.dot_dimension_numbers<[1], [0], [0], [1], [0, 0, 1, 1], [], []>} : vector<256x128xbf16>, vector<128x128xbf16>, vector<256x128xf32> -> vector<256x128xf32>
      %c3 = arith.constant 3 : index
      %c0_22 = arith.constant 0 : index
      %34 = vector.load %arg5[%c3, %c0_22] : memref<8x128xf32, #tpu.memory_space<vmem>>, vector<1x128xf32>
      %35 = vector.broadcast %34 : vector<1x128xf32> to vector<256x128xf32>
      %36 = arith.addf %33, %35 : vector<256x128xf32>
      %cst_23 = arith.constant 0.000000e+00 : f32
      %37 = vector.broadcast %cst_23 : f32 to vector<256x128xf32>
      %38 = arith.maximumf %36, %37 : vector<256x128xf32>
      %39 = arith.truncf %38 : vector<256x128xf32> to vector<256x128xbf16>
      %c3_24 = arith.constant 3 : index
      %c0_25 = arith.constant 0 : index
      %c0_26 = arith.constant 0 : index
      %40 = vector.load %arg3[%c3_24, %c0_25, %c0_26] : memref<4x128x128xbf16, #tpu.memory_space<vmem>>, vector<1x128x128xbf16>
      %41 = vector.shape_cast %40 : vector<1x128x128xbf16> to vector<128x128xbf16>
      %cst_27 = arith.constant dense<0.000000e+00> : vector<256x128xf32>
      %42 = tpu.matmul %39, %41, %cst_27 {dimension_numbers = #tpu.dot_dimension_numbers<[1], [0], [0], [1], [0, 0, 1, 1], [], []>} : vector<256x128xbf16>, vector<128x128xbf16>, vector<256x128xf32> -> vector<256x128xf32>
      %c4 = arith.constant 4 : index
      %c0_28 = arith.constant 0 : index
      %43 = vector.load %arg5[%c4, %c0_28] : memref<8x128xf32, #tpu.memory_space<vmem>>, vector<1x128xf32>
      %44 = vector.broadcast %43 : vector<1x128xf32> to vector<256x128xf32>
      %45 = arith.addf %42, %44 : vector<256x128xf32>
      %cst_29 = arith.constant 0.000000e+00 : f32
      %46 = vector.broadcast %cst_29 : f32 to vector<256x128xf32>
      %47 = arith.maximumf %45, %46 : vector<256x128xf32>
      %48 = arith.truncf %47 : vector<256x128xf32> to vector<256x128xbf16>
      %c0_30 = arith.constant 0 : index
      %c0_31 = arith.constant 0 : index
      %49 = vector.load %arg4[%c0_30, %c0_31] : memref<128x64xbf16, #tpu.memory_space<vmem>>, vector<128x64xbf16>
      %cst_32 = arith.constant dense<0.000000e+00> : vector<256x64xf32>
      %50 = tpu.matmul %48, %49, %cst_32 {dimension_numbers = #tpu.dot_dimension_numbers<[1], [0], [0], [1], [0, 0, 1, 1], [], []>} : vector<256x128xbf16>, vector<128x64xbf16>, vector<256x64xf32> -> vector<256x64xf32>
      %c0_33 = arith.constant 0 : index
      %c0_34 = arith.constant 0 : index
      %51 = vector.load %arg6[%c0_33, %c0_34] : memref<1x64xf32, #tpu.memory_space<vmem>>, vector<1x64xf32>
      %52 = vector.broadcast %51 : vector<1x64xf32> to vector<256x64xf32>
      %53 = arith.addf %50, %52 : vector<256x64xf32>
      %cst_35 = arith.constant 0.000000e+00 : f32
      %54 = vector.broadcast %cst_35 : f32 to vector<256x64xf32>
      %55 = arith.maximumf %53, %54 : vector<256x64xf32>
      %56 = arith.index_cast %2 : i32 to index
      %c0_36 = arith.constant 0 : index
      %57 = vector.load %arg7[%56, %c0_36] : memref<512x64xf32, #tpu.memory_space<vmem>>, vector<256x64xf32>
      tpu.vector_store %arg7[%56, %c0_36], %55 {strides = array<i32>} : memref<512x64xf32, #tpu.memory_space<vmem>>, vector<256x64xf32>,
    }
    %c2_i32_0 = arith.constant 2 : i32
    return
  }
  func.func @transform_0(%arg0: i32) -> (i32, i32) {
    %c0_i32 = arith.constant 0 : i32
    %c0_i32_0 = arith.constant 0 : i32
    return %arg0, %c0_i32 : i32, i32
  }
  func.func @transform_1(%arg0: i32) -> (i32, i32) {
    %c0_i32 = arith.constant 0 : i32
    %c0_i32_0 = arith.constant 0 : i32
    %c0_i32_1 = arith.constant 0 : i32
    return %c0_i32, %c0_i32_0 : i32, i32
  }
  func.func @transform_2(%arg0: i32) -> (i32, i32, i32) {
    %c0_i32 = arith.constant 0 : i32
    %c0_i32_0 = arith.constant 0 : i32
    %c0_i32_1 = arith.constant 0 : i32
    %c0_i32_2 = arith.constant 0 : i32
    return %c0_i32, %c0_i32_0, %c0_i32_1 : i32, i32, i32
  }
  func.func @transform_3(%arg0: i32) -> (i32, i32) {
    %c0_i32 = arith.constant 0 : i32
    %c0_i32_0 = arith.constant 0 : i32
    %c0_i32_1 = arith.constant 0 : i32
    return %c0_i32, %c0_i32_0 : i32, i32
  }
  func.func @transform_4(%arg0: i32) -> (i32, i32) {
    %c0_i32 = arith.constant 0 : i32
    %c0_i32_0 = arith.constant 0 : i32
    %c0_i32_1 = arith.constant 0 : i32
    return %c0_i32, %c0_i32_0 : i32, i32
  }
  func.func @transform_5(%arg0: i32) -> (i32, i32) {
    %c0_i32 = arith.constant 0 : i32
    %c0_i32_0 = arith.constant 0 : i32
    %c0_i32_1 = arith.constant 0 : i32
    return %c0_i32, %c0_i32_0 : i32, i32
  }
  func.func @transform_6(%arg0: i32) -> (i32, i32) {
    %c0_i32 = arith.constant 0 : i32
    %c0_i32_0 = arith.constant 0 : i32
    return %arg0, %c0_i32 : i32, i32
  }
}

</mosaic_0001>

<bundles_post_ra>
// kernel: tpu_custom_call.1
= control target key start
LH: loop header
LB: loop body
LE: loop exit
PB: predicated region body
PF: predicated region fallthrough
CT: control target
= control target key end

     0   :  { %s2857_s21 = smov 0   ;;  %s3365_s0 = inlined_call_operand.vmem [shape: bf16[1024,64], index: 0, kind: input, shape index: {}]   ;;  %s3366_s1 = inlined_call_operand.vmem [shape: bf16[64,128], index: 1, kind: input, shape index: {}]   ;;  %s3367_s2 = inlined_call_operand.vmem [shape: bf16[4,128,128], index: 2, kind: input, shape index: {}]   ;;  %s3368_s3 = inlined_call_operand.vmem [shape: bf16[128,64], index: 3, kind: input, shape index: {}]   ;;  %s3369_s4 = inlined_call_operand.vmem [shape: f32[8,128], index: 4, kind: input, shape index: {}]   ;;  %s3370_s5 = inlined_call_operand.vmem [shape: f32[1,64], index: 5, kind: input, shape index: {}]   ;;  %s3371_s6 = inlined_call_operand.vmem [shape: f32[1024,64], index: 6, kind: output, shape index: {}]  }
   0x1 LB: > { %s2151_s22 = sadd.s32 4294967295, %s2816_s21   ;;  %p2155_p0 = scmp.ge.s32.totalorder %s2816_s21, 1  ;;  %s2816_s21 = sphi %s2857_s21, %s16_s21  }
   0x2   : > { %p213_p1 = scmp.lt.s32.totalorder %s2816_s21, 3 }
   0x4   : > { %p214_p2 = pnand %p2155_p0, %p213_p1 }
   0x5   : > { %s2156_s23 = sshll.u32 (!%p214_p2), %s2151_s22, 6  ;;  %s2875_s8 = smov (!%p214_p2), 0  }
   0x6   : > { %217 = sbr.rel (%p214_p2) target bundleno = 1321 (0x529), region = 44  ;;  %p244_p3 = scmp.lt.s32.totalorder (!%p214_p2), %s2156_s23, 127 }
   0xb   : > { %s3373_s23 = smov (!%p244_p3, %s2156_s23), 127 }
   0xc   : > { %s2157_s24 = sshll.u32 %s3373_s23, 2  ;;  %s2159_s25 = sshll.u32 %s3373_s23, 3 }
   0xd   : > { %s2868_s28 = scalar_lea.vmem %s3365_s0, %s2157_s24  ;;  %s2873_s7 = scalar_lea.vmem %s3371_s6, %s2159_s25 }
   0xe LB: >> { %v2746_v0 = vld [vmem:[%s3366_s1 + $0x18] sm:$0xff]   ;;  %v2747_v1 = vld [vmem:[%s3366_s1 + $0x10] sm:$0xff]   ;;  %s2160_s13 = sshll.u32 %s2820_s8, 8  ;;  %v2748_v2 = vld [vmem:[%s3366_s1 + $0x8] sm:$0xff]   ;;  %vm416_vm0 = vcmask 523264   ;;  %s261_s8 = sadd.s32 1, %s2820_s8   ;;  %s2820_s8 = sphi %s2875_s8, %s261_s8  }
   0xf   : >> { %2434 = vmatprep.subr.bf16.mxu0 %v2746_v0  ;;  %s263_s16 = sshra.s32 %s2160_s13, 3  ;;  %v2766_v3 = vld [vmem:[%s3367_s2 + $0x38] sm:$0xff]   ;;  %v2767_v4 = vld [vmem:[%s3367_s2 + $0x30] sm:$0xff]   ;;  %v2749_v6 = vld [vmem:[%s3366_s1] sm:$0xff]   ;;  %s3262_s18 = scalar_lea.vmem %s2873_s7, %s2160_s13 }
  0x10   : >> { %2435 = vmatpush3.bf16.msra.mxu0 %v2746_v0  ;;  %s2161_s17 = sshll.u32 %s263_s16, 2  ;;  %2474 = vmatprep.subr.bf16.mxu1 %v2766_v3  ;;  %v2768_v11 = vld [vmem:[%s3367_s2 + $0x28] sm:$0xff]   ;;  %v2769_v12 = vld [vmem:[%s3367_s2 + $0x20] sm:$0xff]   ;;  %v2770_v13 = vld [vmem:[%s3367_s2 + $0x18] sm:$0xff]   ;;  %p258_p4 = scmp.ge.s32.totalorder %s261_s8, 2  }
  0x11   : >> { %2436 = vmatprep.subr.bf16.mxu0 %v2747_v1  ;;  %s2896_s20 = scalar_lea.vmem %s2868_s28, %s2161_s17  ;;  %2475 = vmatpush3.bf16.msra.mxu1 %v2766_v3  ;;  %v2771_v25 = vld [vmem:[%s3367_s2 + $0x10] sm:$0xff]   ;;  %v2772_v26 = vld [vmem:[%s3367_s2 + $0x8] sm:$0xff]   ;;  %v2773_v27 = vld [vmem:[%s3367_s2] sm:$0xff]  }
  0x12   : >> { %v2750_v5 = vld [vmem:[%s2896_s20] sm:$0xff]   ;;  %2476 = vmatprep.subr.bf16.mxu1 %v2767_v4  ;;  %v2751_v7 = vld [vmem:[%s2896_s20 + $0x8] sm:$0xff]   ;;  %v2752_v8 = vld [vmem:[%s2896_s20 + $0x10] sm:$0xff]  }
  0x13   : >> { %2442 = vmatprep.mubr.msk.bf16.mxu0 %vm416_vm0, %v2750_v5  ;;  %v2753_v9 = vld [vmem:[%s2896_s20 + $0x18] sm:$0xff]   ;;  %v2754_v10 = vld [vmem:[%s2896_s20 + $0x20] sm:$0xff]   ;;  %v2755_v14 = vld [vmem:[%s2896_s20 + $0x28] sm:$0xff]  }
  0x14   : >> { %2437 = vmatpush3.bf16.msra.mxu0 %v2747_v1  ;;  %v2756_v15 = vld [vmem:[%s2896_s20 + $0x30] sm:$0xff]   ;;  %v2757_v16 = vld [vmem:[%s2896_s20 + $0x38] sm:$0xff]   ;;  %v2758_v17 = vld [vmem:[%s2896_s20 + $0x40] sm:$0xff]  }
  0x15   : >> { %2438 = vmatprep.subr.bf16.mxu0 %v2748_v2  ;;  %2477 = vmatpush3.bf16.msra.mxu1 %v2767_v4  ;;  %v2759_v18 = vld [vmem:[%s2896_s20 + $0x48] sm:$0xff]   ;;  %v2760_v19 = vld [vmem:[%s2896_s20 + $0x50] sm:$0xff]   ;;  %v2761_v20 = vld [vmem:[%s2896_s20 + $0x58] sm:$0xff]  }
  0x16   : >> { %2478 = vmatprep.subr.bf16.mxu1 %v2768_v11  ;;  %v2762_v21 = vld [vmem:[%s2896_s20 + $0x60] sm:$0xff]   ;;  %v2763_v22 = vld [vmem:[%s2896_s20 + $0x68] sm:$0xff]   ;;  %v2764_v23 = vld [vmem:[%s2896_s20 + $0x70] sm:$0xff]  }
  0x17   : >> { %v2765_v24 = vld [vmem:[%s2896_s20 + $0x78] sm:$0xff]   ;;  %v2775_v29 = vld [vmem:[%s3367_s2 + $0x70] sm:$0xff]   ;;  %v2776_v30 = vld [vmem:[%s3367_s2 + $0x68] sm:$0xff]  }
  0x18   : >> { %2439 = vmatpush3.bf16.msra.mxu0 %v2748_v2  ;;  %v2774_v28 = vld [vmem:[%s3367_s2 + $0x78] sm:$0xff]   ;;  %v2777_v31 = vld [vmem:[%s3367_s2 + $0x60] sm:$0xff]   ;;  %v2779_v33 = vld [vmem:[%s3367_s2 + $0x50] sm:$0xff]  }
  0x19   : >> { %2440 = vmatprep.subr.bf16.mxu0 %v2749_v6  ;;  %2479 = vmatpush3.bf16.msra.mxu1 %v2768_v11  ;;  %v2778_v32 = vld [vmem:[%s3367_s2 + $0x58] sm:$0xff]   ;;  %v2780_v34 = vld [vmem:[%s3367_s2 + $0x48] sm:$0xff]   ;;  %v2978_v37 = vld [vmem:[%s3369_s4] ss:$0 sm:$0xff] }
  0x1a   : >> { %2480 = vmatprep.subr.bf16.mxu1 %v2769_v12 }
  0x1c   : >> { %2441 = vmatpush3.bf16.msra.mxu0 %v2749_v6 }
  0x1d   : >> { %2481 = vmatpush3.bf16.msra.mxu1 %v2769_v12  ;;  %2522 = vmatprep.subr.bf16.mxu0 %v2774_v28 }
  0x1e   : >> { %2482 = vmatprep.subr.bf16.mxu1 %v2770_v13 }
  0x1f   : >> { %2443 = vmatmul.mubr.msk.bf16.vlgmr.msra.gmra.mxu0 %vm416_vm0, %v2751_v7 }
  0x20   : >> { %2446 = vmatprep.mubr.msk.bf16.mxu0 %vm416_vm0, %v2752_v8  ;;  %2523 = vmatpush3.bf16.msra.mxu0 %v2774_v28 }
  0x21   : >> { %2483 = vmatpush3.bf16.msra.mxu1 %v2770_v13  ;;  %2524 = vmatprep.subr.bf16.mxu0 %v2775_v29 }
  0x22   : >> { %2484 = vmatprep.subr.bf16.mxu1 %v2771_v25 }
  0x24   : >> { %2525 = vmatpush3.bf16.msra.mxu0 %v2775_v29 }
  0x25   : >> { %2485 = vmatpush3.bf16.msra.mxu1 %v2771_v25  ;;  %2526 = vmatprep.subr.bf16.mxu0 %v2776_v30 }
  0x26   : >> { %2486 = vmatprep.subr.bf16.mxu1 %v2772_v26 }
  0x27   : >> { %2447 = vmatmul.mubr.msk.bf16.gmra.mxu0 %vm416_vm0, %v2753_v9 }
  0x28   : >> { %2450 = vmatprep.mubr.msk.bf16.mxu0 %vm416_vm0, %v2754_v10  ;;  %2527 = vmatpush3.bf16.msra.mxu0 %v2776_v30 }
  0x29   : >> { %2487 = vmatpush3.bf16.msra.mxu1 %v2772_v26  ;;  %2528 = vmatprep.subr.bf16.mxu0 %v2777_v31 }
  0x2a   : >> { %2488 = vmatprep.subr.bf16.mxu1 %v2773_v27 }
  0x2c   : >> { %2529 = vmatpush3.bf16.msra.mxu0 %v2777_v31 }
  0x2d   : >> { %2489 = vmatpush3.bf16.msra.mxu1 %v2773_v27  ;;  %2530 = vmatprep.subr.bf16.mxu0 %v2778_v32 }
  0x2f   : >> { %2451 = vmatmul.mubr.msk.bf16.gmra.mxu0 %vm416_vm0, %v2755_v14 }
  0x30   : >> { %2454 = vmatprep.mubr.msk.bf16.mxu0 %vm416_vm0, %v2756_v15  ;;  %2531 = vmatpush3.bf16.msra.mxu0 %v2778_v32 }
  0x31   : >> { %2532 = vmatprep.subr.bf16.mxu0 %v2779_v33 }
  0x34   : >> { %2533 = vmatpush3.bf16.msra.mxu0 %v2779_v33 }
  0x35   : >> { %2534 = vmatprep.subr.bf16.mxu0 %v2780_v34 }
  0x37   : >> { %2455 = vmatmul.mubr.msk.bf16.gmra.mxu0 %vm416_vm0, %v2757_v16 }
  0x38   : >> { %2458 = vmatprep.mubr.msk.bf16.mxu0 %vm416_vm0, %v2758_v17  ;;  %2535 = vmatpush3.bf16.msra.mxu0 %v2780_v34 }
  0x3f   : >> { %2459 = vmatmul.mubr.msk.bf16.gmra.mxu0 %vm416_vm0, %v2759_v18 }
  0x40   : >> { %2462 = vmatprep.mubr.msk.bf16.mxu0 %vm416_vm0, %v2760_v19 }
  0x47   : >> { %2463 = vmatmul.mubr.msk.bf16.gmra.mxu0 %vm416_vm0, %v2761_v20 }
  0x48   : >> { %2466 = vmatprep.mubr.msk.bf16.mxu0 %vm416_vm0, %v2762_v21 }
  0x4f   : >> { %2467 = vmatmul.mubr.msk.bf16.gmra.mxu0 %vm416_vm0, %v2763_v22 }
  0x50   : >> { %2470 = vmatprep.mubr.msk.bf16.mxu0 %vm416_vm0, %v2764_v23 }
  0x57   : >> { %2471 = vmatmul.mubr.msk.bf16.gmra.mxu0 %vm416_vm0, %v2765_v24 }
  0xdf   : >> { %v2444_v35 = vpop.f32.mrf.mxu0 }
  0xe0   : >> { %v508_v41 = vadd.f32 %v2444_v35, %v2978_v37 }
  0xe1   : >> { %v499_v36 = vpop.f32.mrf.mxu0 }
  0xe2   : >> { %v500_v39 = vadd.f32 %v2978_v37, %v499_v36  ;;  %v628_v48 = vmax.f32 %v508_v41, 0.0 }
  0xe3   : >> { %v2445_v38 = vpop.f32.mrf.mxu0 }
  0xe4   : >> { %v511_v40 = vadd.f32 %v2445_v38, %v2978_v37  ;;  %v626_v46 = vmax.f32 %v500_v39, 0.0 }
  0xe5   : >> { %v502_v42 = vpop.f32.mrf.mxu0 }
  0xe6   : >> { %v503_v43 = vadd.f32 %v2978_v37, %v502_v42  ;;  %v629_v44 = vmax.f32 %v511_v40, 0.0 }
  0xe7   : >> { %v2448_v45 = vpop.f32.mrf.mxu0 }
  0xe8   : >> { %v627_v47 = vmax.f32 %v503_v43, 0.0  ;;  %v659_v51 = vpack.c.bf16 %v629_v44, %v628_v48  ;;  %v524_v55 = vadd.f32 %v2448_v45, %v2978_v37 }
  0xe9   : >> { %v515_v49 = vpop.f32.mrf.mxu0 }
  0xea   : >> { %v658_v50 = vpack.c.bf16 %v627_v47, %v626_v46  ;;  %v516_v53 = vadd.f32 %v2978_v37, %v515_v49  ;;  %v632_v62 = vmax.f32 %v524_v55, 0.0 }
  0xeb   : >> { %v2449_v52 = vpop.f32.mrf.mxu0 }
  0xec   : >> { %v527_v54 = vadd.f32 %v2449_v52, %v2978_v37  ;;  %2490 = vmatprep.mubr.bf16.mxu1 %v658_v50  ;;  %v630_v60 = vmax.f32 %v516_v53, 0.0 }
  0xed   : >> { %v518_v56 = vpop.f32.mrf.mxu0  ;;  %2491 = vmatmul.mubr.bf16.vlgmr.msra.gmra.mxu1 %v659_v51 }
  0xee   : >> { %v519_v57 = vadd.f32 %v2978_v37, %v518_v56  ;;  %v633_v58 = vmax.f32 %v527_v54, 0.0 }
  0xef   : >> { %v2452_v59 = vpop.f32.mrf.mxu0 }
  0xf0   : >> { %v631_v61 = vmax.f32 %v519_v57, 0.0  ;;  %v661_v1 = vpack.c.bf16 %v633_v58, %v632_v62  ;;  %v540_v5 = vadd.f32 %v2452_v59, %v2978_v37 }
  0xf1   : >> { %v531_v63 = vpop.f32.mrf.mxu0 }
  0xf2   : >> { %v660_v0 = vpack.c.bf16 %v631_v61, %v630_v60  ;;  %v532_v3 = vadd.f32 %v2978_v37, %v531_v63  ;;  %v636_v12 = vmax.f32 %v540_v5, 0.0 }
  0xf3   : >> { %v2453_v2 = vpop.f32.mrf.mxu0 }
  0xf4   : >> { %v543_v4 = vadd.f32 %v2453_v2, %v2978_v37  ;;  %2494 = vmatprep.mubr.bf16.mxu1 %v660_v0  ;;  %v634_v10 = vmax.f32 %v532_v3, 0.0 }
  0xf5   : >> { %v534_v6 = vpop.f32.mrf.mxu0  ;;  %2495 = vmatmul.mubr.bf16.gmra.mxu1 %v661_v1 }
  0xf6   : >> { %v535_v7 = vadd.f32 %v2978_v37, %v534_v6  ;;  %v637_v8 = vmax.f32 %v543_v4, 0.0 }
  0xf7   : >> { %v2456_v9 = vpop.f32.mrf.mxu0 }
  0xf8   : >> { %v635_v11 = vmax.f32 %v535_v7, 0.0  ;;  %v663_v15 = vpack.c.bf16 %v637_v8, %v636_v12  ;;  %v556_v19 = vadd.f32 %v2456_v9, %v2978_v37 }
  0xf9   : >> { %v547_v13 = vpop.f32.mrf.mxu0 }
  0xfa   : >> { %v662_v14 = vpack.c.bf16 %v635_v11, %v634_v10  ;;  %v548_v17 = vadd.f32 %v2978_v37, %v547_v13  ;;  %v640_v26 = vmax.f32 %v556_v19, 0.0 }
  0xfb   : >> { %v2457_v16 = vpop.f32.mrf.mxu0 }
  0xfc   : >> { %v559_v18 = vadd.f32 %v2457_v16, %v2978_v37  ;;  %2498 = vmatprep.mubr.bf16.mxu1 %v662_v14  ;;  %v638_v24 = vmax.f32 %v548_v17, 0.0 }
  0xfd   : >> { %v550_v20 = vpop.f32.mrf.mxu0  ;;  %2499 = vmatmul.mubr.bf16.gmra.mxu1 %v663_v15 }
  0xfe   : >> { %v551_v21 = vadd.f32 %v2978_v37, %v550_v20  ;;  %v641_v22 = vmax.f32 %v559_v18, 0.0 }
  0xff   : >> { %v2460_v23 = vpop.f32.mrf.mxu0 }
 0x100   : >> { %v639_v25 = vmax.f32 %v551_v21, 0.0  ;;  %v665_v29 = vpack.c.bf16 %v641_v22, %v640_v26  ;;  %v572_v33 = vadd.f32 %v2460_v23, %v2978_v37  ;;  %v2781_v21 = vld [vmem:[%s3367_s2 + $0x40] sm:$0xff]   ;;  %v2782_v22 = vld [vmem:[%s3367_s2 + $0xb8] sm:$0xff]   ;;  %v2784_v23 = vld [vmem:[%s3367_s2 + $0xa8] sm:$0xff]  }
 0x101   : >> { %v563_v27 = vpop.f32.mrf.mxu0  ;;  %2536 = vmatprep.subr.bf16.mxu0 %v2781_v21  ;;  %2570 = vmatprep.subr.bf16.mxu1 %v2782_v22  ;;  %v2787_v26 = vld [vmem:[%s3367_s2 + $0x90] sm:$0xff]  }
 0x102   : >> { %v664_v28 = vpack.c.bf16 %v639_v25, %v638_v24  ;;  %v564_v31 = vadd.f32 %v2978_v37, %v563_v27  ;;  %v644_v41 = vmax.f32 %v572_v33, 0.0  ;;  %2537 = vmatpush3.bf16.msra.mxu0 %v2781_v21  ;;  %2571 = vmatpush3.bf16.msra.mxu1 %v2782_v22  ;;  %v2785_v24 = vld [vmem:[%s3367_s2 + $0xa0] sm:$0xff]   ;;  %v2786_v25 = vld [vmem:[%s3367_s2 + $0x98] sm:$0xff]   ;;  %v2788_v27 = vld [vmem:[%s3367_s2 + $0x88] sm:$0xff]  }
 0x103   : >> { %v2461_v30 = vpop.f32.mrf.mxu0 }
 0x104   : >> { %v575_v32 = vadd.f32 %v2461_v30, %v2978_v37  ;;  %2502 = vmatprep.mubr.bf16.mxu1 %v664_v28  ;;  %v642_v39 = vmax.f32 %v564_v31, 0.0  ;;  %v3039_v30 = vld [vmem:[%s3369_s4 + $0x1] ss:$0 sm:$0xff] }
 0x105   : >> { %v566_v34 = vpop.f32.mrf.mxu0  ;;  %2503 = vmatmul.mubr.bf16.gmra.mxu1 %v665_v29 }
 0x106   : >> { %v567_v35 = vadd.f32 %v2978_v37, %v566_v34  ;;  %v645_v36 = vmax.f32 %v575_v32, 0.0 }
 0x107   : >> { %v2464_v38 = vpop.f32.mrf.mxu0 }
 0x108   : >> { %v643_v40 = vmax.f32 %v567_v35, 0.0  ;;  %v667_v44 = vpack.c.bf16 %v645_v36, %v644_v41  ;;  %v588_v48 = vadd.f32 %v2464_v38, %v2978_v37 }
 0x109   : >> { %v579_v42 = vpop.f32.mrf.mxu0 }
 0x10a   : >> { %v666_v43 = vpack.c.bf16 %v643_v40, %v642_v39  ;;  %v580_v46 = vadd.f32 %v2978_v37, %v579_v42  ;;  %v648_v55 = vmax.f32 %v588_v48, 0.0 }
 0x10b   : >> { %v2465_v45 = vpop.f32.mrf.mxu0 }
 0x10c   : >> { %v591_v47 = vadd.f32 %v2465_v45, %v2978_v37  ;;  %2506 = vmatprep.mubr.bf16.mxu1 %v666_v43  ;;  %v646_v53 = vmax.f32 %v580_v46, 0.0 }
 0x10d   : >> { %v582_v49 = vpop.f32.mrf.mxu0  ;;  %2507 = vmatmul.mubr.bf16.gmra.mxu1 %v667_v44 }
 0x10e   : >> { %v583_v50 = vadd.f32 %v2978_v37, %v582_v49  ;;  %v649_v51 = vmax.f32 %v591_v47, 0.0 }
 0x10f   : >> { %v2468_v52 = vpop.f32.mrf.mxu0 }
 0x110   : >> { %v647_v54 = vmax.f32 %v583_v50, 0.0  ;;  %v669_v58 = vpack.c.bf16 %v649_v51, %v648_v55  ;;  %v604_v62 = vadd.f32 %v2468_v52, %v2978_v37 }
 0x111   : >> { %v595_v56 = vpop.f32.mrf.mxu0 }
 0x112   : >> { %v668_v57 = vpack.c.bf16 %v647_v54, %v646_v53  ;;  %v596_v60 = vadd.f32 %v2978_v37, %v595_v56  ;;  %v652_v5 = vmax.f32 %v604_v62, 0.0 }
 0x113   : >> { %v2469_v59 = vpop.f32.mrf.mxu0 }
 0x114   : >> { %v607_v61 = vadd.f32 %v2469_v59, %v2978_v37  ;;  %2510 = vmatprep.mubr.bf16.mxu1 %v668_v57  ;;  %v650_v3 = vmax.f32 %v596_v60, 0.0 }
 0x115   : >> { %v598_v63 = vpop.f32.mrf.mxu0  ;;  %2511 = vmatmul.mubr.bf16.gmra.mxu1 %v669_v58 }
 0x116   : >> { %v599_v0 = vadd.f32 %v2978_v37, %v598_v63  ;;  %v653_v1 = vmax.f32 %v607_v61, 0.0 }
 0x117   : >> { %v2472_v2 = vpop.f32.mrf.mxu0 }
 0x118   : >> { %v651_v4 = vmax.f32 %v599_v0, 0.0  ;;  %v671_v8 = vpack.c.bf16 %v653_v1, %v652_v5  ;;  %v620_v12 = vadd.f32 %v2472_v2, %v2978_v37 }
 0x119   : >> { %v611_v6 = vpop.f32.mrf.mxu0 }
 0x11a   : >> { %v670_v7 = vpack.c.bf16 %v651_v4, %v650_v3  ;;  %v612_v10 = vadd.f32 %v2978_v37, %v611_v6  ;;  %v656_v18 = vmax.f32 %v620_v12, 0.0 }
 0x11b   : >> { %v2473_v9 = vpop.f32.mrf.mxu0 }
 0x11c   : >> { %v623_v11 = vadd.f32 %v2473_v9, %v2978_v37  ;;  %2514 = vmatprep.mubr.bf16.mxu1 %v670_v7  ;;  %v654_v16 = vmax.f32 %v612_v10, 0.0 }
 0x11d   : >> { %v614_v13 = vpop.f32.mrf.mxu0  ;;  %2515 = vmatmul.mubr.bf16.gmra.mxu1 %v671_v8 }
 0x11e   : >> { %v615_v14 = vadd.f32 %v2978_v37, %v614_v13  ;;  %v657_v15 = vmax.f32 %v623_v11, 0.0  ;;  %v2783_v37 = vld [vmem:[%s3367_s2 + $0xb0] sm:$0xff]  }
 0x11f   : >> { %2572 = vmatprep.subr.bf16.mxu1 %v2783_v37 }
 0x120   : >> { %v655_v17 = vmax.f32 %v615_v14, 0.0  ;;  %v673_v20 = vpack.c.bf16 %v657_v15, %v656_v18  ;;  %2573 = vmatpush3.bf16.msra.mxu1 %v2783_v37 }
 0x121   : >> { %2574 = vmatprep.subr.bf16.mxu1 %v2784_v23 }
 0x122   : >> { %v672_v19 = vpack.c.bf16 %v655_v17, %v654_v16 }
 0x124   : >> { %2518 = vmatprep.mubr.bf16.mxu1 %v672_v19  ;;  %2575 = vmatpush3.bf16.msra.mxu1 %v2784_v23 }
 0x125   : >> { %2519 = vmatmul.mubr.bf16.gmra.mxu1 %v673_v20  ;;  %2576 = vmatprep.subr.bf16.mxu1 %v2785_v24 }
 0x128   : >> { %2577 = vmatpush3.bf16.msra.mxu1 %v2785_v24 }
 0x129   : >> { %2578 = vmatprep.subr.bf16.mxu1 %v2786_v25 }
 0x12c   : >> { %2579 = vmatpush3.bf16.msra.mxu1 %v2786_v25 }
 0x12d   : >> { %2580 = vmatprep.subr.bf16.mxu1 %v2787_v26 }
 0x130   : >> { %2581 = vmatpush3.bf16.msra.mxu1 %v2787_v26 }
 0x131   : >> { %2582 = vmatprep.subr.bf16.mxu1 %v2788_v27 }
 0x134   : >> { %2583 = vmatpush3.bf16.msra.mxu1 %v2788_v27 }
 0x1ad   : >> { %v2492_v28 = vpop.f32.mrf.mxu1 }
 0x1ae   : >> { %v786_v34 = vadd.f32 %v2492_v28, %v3039_v30 }
 0x1af   : >> { %v777_v29 = vpop.f32.mrf.mxu1 }
 0x1b0   : >> { %v778_v32 = vadd.f32 %v3039_v30, %v777_v29  ;;  %v906_v42 = vmax.f32 %v786_v34, 0.0 }
 0x1b1   : >> { %v2493_v31 = vpop.f32.mrf.mxu1 }
 0x1b2   : >> { %v789_v33 = vadd.f32 %v2493_v31, %v3039_v30  ;;  %v904_v40 = vmax.f32 %v778_v32, 0.0 }
 0x1b3   : >> { %v780_v35 = vpop.f32.mrf.mxu1 }
 0x1b4   : >> { %v781_v36 = vadd.f32 %v3039_v30, %v780_v35  ;;  %v907_v38 = vmax.f32 %v789_v33, 0.0 }
 0x1b5   : >> { %v2496_v39 = vpop.f32.mrf.mxu1 }
 0x1b6   : >> { %v905_v41 = vmax.f32 %v781_v36, 0.0  ;;  %v937_v45 = vpack.c.bf16 %v907_v38, %v906_v42  ;;  %v802_v49 = vadd.f32 %v2496_v39, %v3039_v30 }
 0x1b7   : >> { %v793_v43 = vpop.f32.mrf.mxu1 }
 0x1b8   : >> { %v936_v44 = vpack.c.bf16 %v905_v41, %v904_v40  ;;  %v794_v47 = vadd.f32 %v3039_v30, %v793_v43  ;;  %v910_v56 = vmax.f32 %v802_v49, 0.0 }
 0x1b9   : >> { %v2497_v46 = vpop.f32.mrf.mxu1 }
 0x1ba   : >> { %v805_v48 = vadd.f32 %v2497_v46, %v3039_v30  ;;  %2538 = vmatprep.mubr.bf16.mxu0 %v936_v44  ;;  %v908_v54 = vmax.f32 %v794_v47, 0.0 }
 0x1bb   : >> { %v796_v50 = vpop.f32.mrf.mxu1  ;;  %2539 = vmatmul.mubr.bf16.vlgmr.msra.gmra.mxu0 %v937_v45 }
 0x1bc   : >> { %v797_v51 = vadd.f32 %v3039_v30, %v796_v50  ;;  %v911_v52 = vmax.f32 %v805_v48, 0.0 }
 0x1bd   : >> { %v2500_v53 = vpop.f32.mrf.mxu1 }
 0x1be   : >> { %v909_v55 = vmax.f32 %v797_v51, 0.0  ;;  %v939_v59 = vpack.c.bf16 %v911_v52, %v910_v56  ;;  %v818_v63 = vadd.f32 %v2500_v53, %v3039_v30 }
 0x1bf   : >> { %v809_v57 = vpop.f32.mrf.mxu1 }
 0x1c0   : >> { %v938_v58 = vpack.c.bf16 %v909_v55, %v908_v54  ;;  %v810_v61 = vadd.f32 %v3039_v30, %v809_v57  ;;  %v914_v6 = vmax.f32 %v818_v63, 0.0 }
 0x1c1   : >> { %v2501_v60 = vpop.f32.mrf.mxu1 }
 0x1c2   : >> { %v821_v62 = vadd.f32 %v2501_v60, %v3039_v30  ;;  %2542 = vmatprep.mubr.bf16.mxu0 %v938_v58  ;;  %v912_v4 = vmax.f32 %v810_v61, 0.0 }
 0x1c3   : >> { %v812_v0 = vpop.f32.mrf.mxu1  ;;  %2543 = vmatmul.mubr.bf16.gmra.mxu0 %v939_v59 }
 0x1c4   : >> { %v813_v1 = vadd.f32 %v3039_v30, %v812_v0  ;;  %v915_v2 = vmax.f32 %v821_v62, 0.0 }
 0x1c5   : >> { %v2504_v3 = vpop.f32.mrf.mxu1 }
 0x1c6   : >> { %v913_v5 = vmax.f32 %v813_v1, 0.0  ;;  %v941_v9 = vpack.c.bf16 %v915_v2, %v914_v6  ;;  %v834_v13 = vadd.f32 %v2504_v3, %v3039_v30 }
 0x1c7   : >> { %v825_v7 = vpop.f32.mrf.mxu1 }
 0x1c8   : >> { %v940_v8 = vpack.c.bf16 %v913_v5, %v912_v4  ;;  %v826_v11 = vadd.f32 %v3039_v30, %v825_v7  ;;  %v918_v20 = vmax.f32 %v834_v13, 0.0 }
 0x1c9   : >> { %v2505_v10 = vpop.f32.mrf.mxu1 }
 0x1ca   : >> { %v837_v12 = vadd.f32 %v2505_v10, %v3039_v30  ;;  %2546 = vmatprep.mubr.bf16.mxu0 %v940_v8  ;;  %v916_v18 = vmax.f32 %v826_v11, 0.0 }
 0x1cb   : >> { %v828_v14 = vpop.f32.mrf.mxu1  ;;  %2547 = vmatmul.mubr.bf16.gmra.mxu0 %v941_v9 }
 0x1cc   : >> { %v829_v15 = vadd.f32 %v3039_v30, %v828_v14  ;;  %v919_v16 = vmax.f32 %v837_v12, 0.0 }
 0x1cd   : >> { %v2508_v17 = vpop.f32.mrf.mxu1 }
 0x1ce   : >> { %v917_v19 = vmax.f32 %v829_v15, 0.0  ;;  %v943_v37 = vpack.c.bf16 %v919_v16, %v918_v20  ;;  %v850_v26 = vadd.f32 %v2508_v17, %v3039_v30  ;;  %v2789_v15 = vld [vmem:[%s3367_s2 + $0x80] sm:$0xff]   ;;  %v2790_v16 = vld [vmem:[%s3367_s2 + $0xf8] sm:$0xff]   ;;  %v2792_v17 = vld [vmem:[%s3367_s2 + $0xe8] sm:$0xff]  }
 0x1cf   : >> { %v841_v21 = vpop.f32.mrf.mxu1  ;;  %2584 = vmatprep.subr.bf16.mxu1 %v2789_v15  ;;  %2618 = vmatprep.subr.bf16.mxu0 %v2790_v16  ;;  %v2795_v20 = vld [vmem:[%s3367_s2 + $0xd0] sm:$0xff]  }
 0x1d0   : >> { %v942_v22 = vpack.c.bf16 %v917_v19, %v916_v18  ;;  %v842_v24 = vadd.f32 %v3039_v30, %v841_v21  ;;  %v922_v34 = vmax.f32 %v850_v26, 0.0  ;;  %2585 = vmatpush3.bf16.msra.mxu1 %v2789_v15  ;;  %2619 = vmatpush3.bf16.msra.mxu0 %v2790_v16  ;;  %v2793_v18 = vld [vmem:[%s3367_s2 + $0xe0] sm:$0xff]   ;;  %v2794_v19 = vld [vmem:[%s3367_s2 + $0xd8] sm:$0xff]   ;;  %v2796_v21 = vld [vmem:[%s3367_s2 + $0xc8] sm:$0xff]  }
 0x1d1   : >> { %v2509_v23 = vpop.f32.mrf.mxu1 }
 0x1d2   : >> { %v853_v25 = vadd.f32 %v2509_v23, %v3039_v30  ;;  %2550 = vmatprep.mubr.bf16.mxu0 %v942_v22  ;;  %v920_v32 = vmax.f32 %v842_v24, 0.0  ;;  %v3100_v23 = vld [vmem:[%s3369_s4 + $0x2] ss:$0 sm:$0xff] }
 0x1d3   : >> { %v844_v27 = vpop.f32.mrf.mxu1  ;;  %2551 = vmatmul.mubr.bf16.gmra.mxu0 %v943_v37 }
 0x1d4   : >> { %v845_v28 = vadd.f32 %v3039_v30, %v844_v27  ;;  %v923_v29 = vmax.f32 %v853_v25, 0.0 }
 0x1d5   : >> { %v2512_v31 = vpop.f32.mrf.mxu1 }
 0x1d6   : >> { %v921_v33 = vmax.f32 %v845_v28, 0.0  ;;  %v945_v38 = vpack.c.bf16 %v923_v29, %v922_v34  ;;  %v866_v42 = vadd.f32 %v2512_v31, %v3039_v30 }
 0x1d7   : >> { %v857_v35 = vpop.f32.mrf.mxu1 }
 0x1d8   : >> { %v944_v36 = vpack.c.bf16 %v921_v33, %v920_v32  ;;  %v858_v40 = vadd.f32 %v3039_v30, %v857_v35  ;;  %v926_v49 = vmax.f32 %v866_v42, 0.0 }
 0x1d9   : >> { %v2513_v39 = vpop.f32.mrf.mxu1 }
 0x1da   : >> { %v869_v41 = vadd.f32 %v2513_v39, %v3039_v30  ;;  %2554 = vmatprep.mubr.bf16.mxu0 %v944_v36  ;;  %v924_v47 = vmax.f32 %v858_v40, 0.0 }
 0x1db   : >> { %v860_v43 = vpop.f32.mrf.mxu1  ;;  %2555 = vmatmul.mubr.bf16.gmra.mxu0 %v945_v38 }
 0x1dc   : >> { %v861_v44 = vadd.f32 %v3039_v30, %v860_v43  ;;  %v927_v45 = vmax.f32 %v869_v41, 0.0 }
 0x1dd   : >> { %v2516_v46 = vpop.f32.mrf.mxu1 }
 0x1de   : >> { %v925_v48 = vmax.f32 %v861_v44, 0.0  ;;  %v947_v52 = vpack.c.bf16 %v927_v45, %v926_v49  ;;  %v882_v56 = vadd.f32 %v2516_v46, %v3039_v30 }
 0x1df   : >> { %v873_v50 = vpop.f32.mrf.mxu1 }
 0x1e0   : >> { %v946_v51 = vpack.c.bf16 %v925_v48, %v924_v47  ;;  %v874_v54 = vadd.f32 %v3039_v30, %v873_v50  ;;  %v930_v63 = vmax.f32 %v882_v56, 0.0 }
 0x1e1   : >> { %v2517_v53 = vpop.f32.mrf.mxu1 }
 0x1e2   : >> { %v885_v55 = vadd.f32 %v2517_v53, %v3039_v30  ;;  %2558 = vmatprep.mubr.bf16.mxu0 %v946_v51  ;;  %v928_v61 = vmax.f32 %v874_v54, 0.0 }
 0x1e3   : >> { %v876_v57 = vpop.f32.mrf.mxu1  ;;  %2559 = vmatmul.mubr.bf16.gmra.mxu0 %v947_v52 }
 0x1e4   : >> { %v877_v58 = vadd.f32 %v3039_v30, %v876_v57  ;;  %v931_v59 = vmax.f32 %v885_v55, 0.0 }
 0x1e5   : >> { %v2520_v60 = vpop.f32.mrf.mxu1 }
 0x1e6   : >> { %v929_v62 = vmax.f32 %v877_v58, 0.0  ;;  %v949_v2 = vpack.c.bf16 %v931_v59, %v930_v63  ;;  %v898_v6 = vadd.f32 %v2520_v60, %v3039_v30 }
 0x1e7   : >> { %v889_v0 = vpop.f32.mrf.mxu1 }
 0x1e8   : >> { %v948_v1 = vpack.c.bf16 %v929_v62, %v928_v61  ;;  %v890_v4 = vadd.f32 %v3039_v30, %v889_v0  ;;  %v934_v12 = vmax.f32 %v898_v6, 0.0 }
 0x1e9   : >> { %v2521_v3 = vpop.f32.mrf.mxu1 }
 0x1ea   : >> { %v901_v5 = vadd.f32 %v2521_v3, %v3039_v30  ;;  %2562 = vmatprep.mubr.bf16.mxu0 %v948_v1  ;;  %v932_v10 = vmax.f32 %v890_v4, 0.0 }
 0x1eb   : >> { %v892_v7 = vpop.f32.mrf.mxu1  ;;  %2563 = vmatmul.mubr.bf16.gmra.mxu0 %v949_v2 }
 0x1ec   : >> { %v893_v8 = vadd.f32 %v3039_v30, %v892_v7  ;;  %v935_v9 = vmax.f32 %v901_v5, 0.0  ;;  %v2791_v30 = vld [vmem:[%s3367_s2 + $0xf0] sm:$0xff]  }
 0x1ed   : >> { %2620 = vmatprep.subr.bf16.mxu0 %v2791_v30 }
 0x1ee   : >> { %v933_v11 = vmax.f32 %v893_v8, 0.0  ;;  %v951_v14 = vpack.c.bf16 %v935_v9, %v934_v12  ;;  %2621 = vmatpush3.bf16.msra.mxu0 %v2791_v30 }
 0x1ef   : >> { %2622 = vmatprep.subr.bf16.mxu0 %v2792_v17 }
 0x1f0   : >> { %v950_v13 = vpack.c.bf16 %v933_v11, %v932_v10 }
 0x1f2   : >> { %2566 = vmatprep.mubr.bf16.mxu0 %v950_v13  ;;  %2623 = vmatpush3.bf16.msra.mxu0 %v2792_v17 }
 0x1f3   : >> { %2567 = vmatmul.mubr.bf16.gmra.mxu0 %v951_v14  ;;  %2624 = vmatprep.subr.bf16.mxu0 %v2793_v18 }
 0x1f6   : >> { %2625 = vmatpush3.bf16.msra.mxu0 %v2793_v18 }
 0x1f7   : >> { %2626 = vmatprep.subr.bf16.mxu0 %v2794_v19 }
 0x1fa   : >> { %2627 = vmatpush3.bf16.msra.mxu0 %v2794_v19 }
 0x1fb   : >> { %2628 = vmatprep.subr.bf16.mxu0 %v2795_v20 }
 0x1fe   : >> { %2629 = vmatpush3.bf16.msra.mxu0 %v2795_v20 }
 0x1ff   : >> { %2630 = vmatprep.subr.bf16.mxu0 %v2796_v21 }
 0x202   : >> { %2631 = vmatpush3.bf16.msra.mxu0 %v2796_v21 }
 0x27b   : >> { %v2540_v22 = vpop.f32.mrf.mxu0 }
 0x27c   : >> { %v1065_v27 = vadd.f32 %v2540_v22, %v3100_v23 }
 0x27d   : >> { %v1056_v37 = vpop.f32.mrf.mxu0 }
 0x27e   : >> { %v1057_v25 = vadd.f32 %v3100_v23, %v1056_v37  ;;  %v1185_v35 = vmax.f32 %v1065_v27, 0.0 }
 0x27f   : >> { %v2541_v24 = vpop.f32.mrf.mxu0 }
 0x280   : >> { %v1068_v26 = vadd.f32 %v2541_v24, %v3100_v23  ;;  %v1183_v33 = vmax.f32 %v1057_v25, 0.0 }
 0x281   : >> { %v1059_v28 = vpop.f32.mrf.mxu0 }
 0x282   : >> { %v1060_v29 = vadd.f32 %v3100_v23, %v1059_v28  ;;  %v1186_v31 = vmax.f32 %v1068_v26, 0.0 }
 0x283   : >> { %v2544_v32 = vpop.f32.mrf.mxu0 }
 0x284   : >> { %v1184_v34 = vmax.f32 %v1060_v29, 0.0  ;;  %v1216_v39 = vpack.c.bf16 %v1186_v31, %v1185_v35  ;;  %v1081_v43 = vadd.f32 %v2544_v32, %v3100_v23 }
 0x285   : >> { %v1072_v36 = vpop.f32.mrf.mxu0 }
 0x286   : >> { %v1215_v38 = vpack.c.bf16 %v1184_v34, %v1183_v33  ;;  %v1073_v41 = vadd.f32 %v3100_v23, %v1072_v36  ;;  %v1189_v50 = vmax.f32 %v1081_v43, 0.0 }
 0x287   : >> { %v2545_v40 = vpop.f32.mrf.mxu0 }
 0x288   : >> { %v1084_v42 = vadd.f32 %v2545_v40, %v3100_v23  ;;  %2586 = vmatprep.mubr.bf16.mxu1 %v1215_v38  ;;  %v1187_v48 = vmax.f32 %v1073_v41, 0.0 }
 0x289   : >> { %v1075_v44 = vpop.f32.mrf.mxu0  ;;  %2587 = vmatmul.mubr.bf16.vlgmr.msra.gmra.mxu1 %v1216_v39 }
 0x28a   : >> { %v1076_v45 = vadd.f32 %v3100_v23, %v1075_v44  ;;  %v1190_v46 = vmax.f32 %v1084_v42, 0.0 }
 0x28b   : >> { %v2548_v47 = vpop.f32.mrf.mxu0 }
 0x28c   : >> { %v1188_v49 = vmax.f32 %v1076_v45, 0.0  ;;  %v1218_v53 = vpack.c.bf16 %v1190_v46, %v1189_v50  ;;  %v1097_v57 = vadd.f32 %v2548_v47, %v3100_v23 }
 0x28d   : >> { %v1088_v51 = vpop.f32.mrf.mxu0 }
 0x28e   : >> { %v1217_v52 = vpack.c.bf16 %v1188_v49, %v1187_v48  ;;  %v1089_v55 = vadd.f32 %v3100_v23, %v1088_v51  ;;  %v1193_v0 = vmax.f32 %v1097_v57, 0.0 }
 0x28f   : >> { %v2549_v54 = vpop.f32.mrf.mxu0 }
 0x290   : >> { %v1100_v56 = vadd.f32 %v2549_v54, %v3100_v23  ;;  %2590 = vmatprep.mubr.bf16.mxu1 %v1217_v52  ;;  %v1191_v62 = vmax.f32 %v1089_v55, 0.0 }
 0x291   : >> { %v1091_v58 = vpop.f32.mrf.mxu0  ;;  %2591 = vmatmul.mubr.bf16.gmra.mxu1 %v1218_v53 }
 0x292   : >> { %v1092_v59 = vadd.f32 %v3100_v23, %v1091_v58  ;;  %v1194_v60 = vmax.f32 %v1100_v56, 0.0 }
 0x293   : >> { %v2552_v61 = vpop.f32.mrf.mxu0 }
 0x294   : >> { %v1192_v63 = vmax.f32 %v1092_v59, 0.0  ;;  %v1220_v3 = vpack.c.bf16 %v1194_v60, %v1193_v0  ;;  %v1113_v7 = vadd.f32 %v2552_v61, %v3100_v23 }
 0x295   : >> { %v1104_v1 = vpop.f32.mrf.mxu0 }
 0x296   : >> { %v1219_v2 = vpack.c.bf16 %v1192_v63, %v1191_v62  ;;  %v1105_v5 = vadd.f32 %v3100_v23, %v1104_v1  ;;  %v1197_v14 = vmax.f32 %v1113_v7, 0.0 }
 0x297   : >> { %v2553_v4 = vpop.f32.mrf.mxu0 }
 0x298   : >> { %v1116_v6 = vadd.f32 %v2553_v4, %v3100_v23  ;;  %2594 = vmatprep.mubr.bf16.mxu1 %v1219_v2  ;;  %v1195_v12 = vmax.f32 %v1105_v5, 0.0 }
 0x299   : >> { %v1107_v8 = vpop.f32.mrf.mxu0  ;;  %2595 = vmatmul.mubr.bf16.gmra.mxu1 %v1220_v3 }
 0x29a   : >> { %v1108_v9 = vadd.f32 %v3100_v23, %v1107_v8  ;;  %v1198_v10 = vmax.f32 %v1116_v6, 0.0 }
 0x29b   : >> { %v2556_v11 = vpop.f32.mrf.mxu0 }
 0x29c   : >> { %v1196_v13 = vmax.f32 %v1108_v9, 0.0  ;;  %v1222_v30 = vpack.c.bf16 %v1198_v10, %v1197_v14  ;;  %v1129_v20 = vadd.f32 %v2556_v11, %v3100_v23  ;;  %v2797_v9 = vld [vmem:[%s3367_s2 + $0xc0] sm:$0xff]   ;;  %v2798_v10 = vld [vmem:[%s3368_s3 + $0x38] sm:$0xff]   ;;  %v2800_v11 = vld [vmem:[%s3368_s3 + $0x28] sm:$0xff]  }
 0x29d   : >> { %v1120_v15 = vpop.f32.mrf.mxu0  ;;  %2632 = vmatprep.subr.bf16.mxu0 %v2797_v9  ;;  %2714 = vmatprep.subr.bf16.mxu1 %v2798_v10  ;;  %v3162_v14 = vld [vmem:[%s3368_s3 + $0x10] sm:$0xff]  }
 0x29e   : >> { %v1221_v16 = vpack.c.bf16 %v1196_v13, %v1195_v12  ;;  %v1121_v18 = vadd.f32 %v3100_v23, %v1120_v15  ;;  %v1201_v27 = vmax.f32 %v1129_v20, 0.0  ;;  %2633 = vmatpush3.bf16.msra.mxu0 %v2797_v9  ;;  %2722 = vmatpush3.bf16.msra.mxu1 %v2798_v10  ;;  %v3149_v12 = vld [vmem:[%s3368_s3 + $0x20] sm:$0xff]   ;;  %v3155_v13 = vld [vmem:[%s3368_s3 + $0x18] sm:$0xff]  }
 0x29f   : >> { %v2557_v17 = vpop.f32.mrf.mxu0  ;;  %2666 = vmatprep.subr.bf16.mxu0 %v2798_v10 }
 0x2a0   : >> { %v1132_v19 = vadd.f32 %v2557_v17, %v3100_v23  ;;  %2598 = vmatprep.mubr.bf16.mxu1 %v1221_v16  ;;  %v1199_v25 = vmax.f32 %v1121_v18, 0.0 }
 0x2a1   : >> { %v1123_v21 = vpop.f32.mrf.mxu0  ;;  %2599 = vmatmul.mubr.bf16.gmra.mxu1 %v1222_v30  ;;  %v3170_v30 = vld [vmem:[%s3369_s4 + $0x3] ss:$0 sm:$0xff] }
 0x2a2   : >> { %v1124_v22 = vadd.f32 %v3100_v23, %v1123_v21  ;;  %v1202_v37 = vmax.f32 %v1132_v19, 0.0 }
 0x2a3   : >> { %v2560_v24 = vpop.f32.mrf.mxu0 }
 0x2a4   : >> { %v1200_v26 = vmax.f32 %v1124_v22, 0.0  ;;  %v1224_v31 = vpack.c.bf16 %v1202_v37, %v1201_v27  ;;  %v1145_v35 = vadd.f32 %v2560_v24, %v3100_v23 }
 0x2a5   : >> { %v1136_v28 = vpop.f32.mrf.mxu0 }
 0x2a6   : >> { %v1223_v29 = vpack.c.bf16 %v1200_v26, %v1199_v25  ;;  %v1137_v33 = vadd.f32 %v3100_v23, %v1136_v28  ;;  %v1205_v43 = vmax.f32 %v1145_v35, 0.0 }
 0x2a7   : >> { %v2561_v32 = vpop.f32.mrf.mxu0 }
 0x2a8   : >> { %v1148_v34 = vadd.f32 %v2561_v32, %v3100_v23  ;;  %2602 = vmatprep.mubr.bf16.mxu1 %v1223_v29  ;;  %v1203_v41 = vmax.f32 %v1137_v33, 0.0 }
 0x2a9   : >> { %v1139_v36 = vpop.f32.mrf.mxu0  ;;  %2603 = vmatmul.mubr.bf16.gmra.mxu1 %v1224_v31 }
 0x2aa   : >> { %v1140_v38 = vadd.f32 %v3100_v23, %v1139_v36  ;;  %v1206_v39 = vmax.f32 %v1148_v34, 0.0 }
 0x2ab   : >> { %v2564_v40 = vpop.f32.mrf.mxu0 }
 0x2ac   : >> { %v1204_v42 = vmax.f32 %v1140_v38, 0.0  ;;  %v1226_v46 = vpack.c.bf16 %v1206_v39, %v1205_v43  ;;  %v1161_v50 = vadd.f32 %v2564_v40, %v3100_v23 }
 0x2ad   : >> { %v1152_v44 = vpop.f32.mrf.mxu0 }
 0x2ae   : >> { %v1225_v45 = vpack.c.bf16 %v1204_v42, %v1203_v41  ;;  %v1153_v48 = vadd.f32 %v3100_v23, %v1152_v44  ;;  %v1209_v57 = vmax.f32 %v1161_v50, 0.0 }
 0x2af   : >> { %v2565_v47 = vpop.f32.mrf.mxu0 }
 0x2b0   : >> { %v1164_v49 = vadd.f32 %v2565_v47, %v3100_v23  ;;  %2606 = vmatprep.mubr.bf16.mxu1 %v1225_v45  ;;  %v1207_v55 = vmax.f32 %v1153_v48, 0.0 }
 0x2b1   : >> { %v1155_v51 = vpop.f32.mrf.mxu0  ;;  %2607 = vmatmul.mubr.bf16.gmra.mxu1 %v1226_v46 }
 0x2b2   : >> { %v1156_v52 = vadd.f32 %v3100_v23, %v1155_v51  ;;  %v1210_v53 = vmax.f32 %v1164_v49, 0.0 }
 0x2b3   : >> { %v2568_v54 = vpop.f32.mrf.mxu0 }
 0x2b4   : >> { %v1208_v56 = vmax.f32 %v1156_v52, 0.0  ;;  %v1228_v60 = vpack.c.bf16 %v1210_v53, %v1209_v57  ;;  %v1177_v0 = vadd.f32 %v2568_v54, %v3100_v23 }
 0x2b5   : >> { %v1168_v58 = vpop.f32.mrf.mxu0 }
 0x2b6   : >> { %v1227_v59 = vpack.c.bf16 %v1208_v56, %v1207_v55  ;;  %v1169_v62 = vadd.f32 %v3100_v23, %v1168_v58  ;;  %v1213_v6 = vmax.f32 %v1177_v0, 0.0 }
 0x2b7   : >> { %v2569_v61 = vpop.f32.mrf.mxu0 }
 0x2b8   : >> { %v1180_v63 = vadd.f32 %v2569_v61, %v3100_v23  ;;  %2610 = vmatprep.mubr.bf16.mxu1 %v1227_v59  ;;  %v1211_v4 = vmax.f32 %v1169_v62, 0.0 }
 0x2b9   : >> { %v1171_v1 = vpop.f32.mrf.mxu0  ;;  %2611 = vmatmul.mubr.bf16.gmra.mxu1 %v1228_v60 }
 0x2ba   : >> { %v1172_v2 = vadd.f32 %v3100_v23, %v1171_v1  ;;  %v1214_v3 = vmax.f32 %v1180_v63, 0.0  ;;  %v2799_v23 = vld [vmem:[%s3368_s3 + $0x30] sm:$0xff]  }
 0x2bb   : >> { %2715 = vmatprep.subr.bf16.mxu1 %v2799_v23 }
 0x2bc   : >> { %v1212_v5 = vmax.f32 %v1172_v2, 0.0  ;;  %v1230_v8 = vpack.c.bf16 %v1214_v3, %v1213_v6  ;;  %2723 = vmatpush3.bf16.msra.mxu1 %v2799_v23 }
 0x2bd   : >> { %2716 = vmatprep.subr.bf16.mxu1 %v2800_v11 }
 0x2be   : >> { %v1229_v7 = vpack.c.bf16 %v1212_v5, %v1211_v4 }
 0x2c0   : >> { %2614 = vmatprep.mubr.bf16.mxu1 %v1229_v7  ;;  %2724 = vmatpush3.bf16.msra.mxu1 %v2800_v11 }
 0x2c1   : >> { %2615 = vmatmul.mubr.bf16.gmra.mxu1 %v1230_v8  ;;  %2717 = vmatprep.subr.bf16.mxu1 %v3149_v12 }
 0x2c4   : >> { %2725 = vmatpush3.bf16.msra.mxu1 %v3149_v12 }
 0x2c5   : >> { %2718 = vmatprep.subr.bf16.mxu1 %v3155_v13 }
 0x2c8   : >> { %2726 = vmatpush3.bf16.msra.mxu1 %v3155_v13 }
 0x2c9   : >> { %2719 = vmatprep.subr.bf16.mxu1 %v3162_v14 }
 0x2cc   : >> { %2727 = vmatpush3.bf16.msra.mxu1 %v3162_v14 }
 0x349   : >> { %v2588_v15 = vpop.f32.mrf.mxu1 }
 0x34a   : >> { %v1344_v20 = vadd.f32 %v2588_v15, %v3170_v30 }
 0x34b   : >> { %v1335_v16 = vpop.f32.mrf.mxu1 }
 0x34c   : >> { %v1336_v18 = vadd.f32 %v3170_v30, %v1335_v16  ;;  %v1464_v27 = vmax.f32 %v1344_v20, 0.0 }
 0x34d   : >> { %v2589_v17 = vpop.f32.mrf.mxu1 }
 0x34e   : >> { %v1347_v19 = vadd.f32 %v2589_v17, %v3170_v30  ;;  %v1462_v25 = vmax.f32 %v1336_v18, 0.0 }
 0x34f   : >> { %v1338_v21 = vpop.f32.mrf.mxu1 }
 0x350   : >> { %v1339_v22 = vadd.f32 %v3170_v30, %v1338_v21  ;;  %v1465_v37 = vmax.f32 %v1347_v19, 0.0 }
 0x351   : >> { %v2592_v24 = vpop.f32.mrf.mxu1 }
 0x352   : >> { %v1463_v26 = vmax.f32 %v1339_v22, 0.0  ;;  %v1495_v31 = vpack.c.bf16 %v1465_v37, %v1464_v27  ;;  %v1360_v35 = vadd.f32 %v2592_v24, %v3170_v30 }
 0x353   : >> { %v1351_v28 = vpop.f32.mrf.mxu1 }
 0x354   : >> { %v1494_v29 = vpack.c.bf16 %v1463_v26, %v1462_v25  ;;  %v1352_v33 = vadd.f32 %v3170_v30, %v1351_v28  ;;  %v1468_v43 = vmax.f32 %v1360_v35, 0.0 }
 0x355   : >> { %v2593_v32 = vpop.f32.mrf.mxu1 }
 0x356   : >> { %v1363_v34 = vadd.f32 %v2593_v32, %v3170_v30  ;;  %2634 = vmatprep.mubr.bf16.mxu0 %v1494_v29  ;;  %v1466_v41 = vmax.f32 %v1352_v33, 0.0 }
 0x357   : >> { %v1354_v36 = vpop.f32.mrf.mxu1  ;;  %2635 = vmatmul.mubr.bf16.vlgmr.msra.gmra.mxu0 %v1495_v31 }
 0x358   : >> { %v1355_v38 = vadd.f32 %v3170_v30, %v1354_v36  ;;  %2667 = vmatpush3.bf16.msra.mxu0 %v2798_v10  ;;  %v1469_v39 = vmax.f32 %v1363_v34, 0.0 }
 0x359   : >> { %v2596_v40 = vpop.f32.mrf.mxu1  ;;  %2668 = vmatprep.subr.bf16.mxu0 %v2799_v23 }
 0x35a   : >> { %v1467_v42 = vmax.f32 %v1355_v38, 0.0  ;;  %v1497_v46 = vpack.c.bf16 %v1469_v39, %v1468_v43  ;;  %v1376_v50 = vadd.f32 %v2596_v40, %v3170_v30 }
 0x35b   : >> { %v1367_v44 = vpop.f32.mrf.mxu1 }
 0x35c   : >> { %v1496_v45 = vpack.c.bf16 %v1467_v42, %v1466_v41  ;;  %2669 = vmatpush3.bf16.msra.mxu0 %v2799_v23  ;;  %v1368_v48 = vadd.f32 %v3170_v30, %v1367_v44  ;;  %v1472_v57 = vmax.f32 %v1376_v50, 0.0 }
 0x35d   : >> { %v2597_v47 = vpop.f32.mrf.mxu1  ;;  %2670 = vmatprep.subr.bf16.mxu0 %v2800_v11 }
 0x35e   : >> { %v1379_v49 = vadd.f32 %v2597_v47, %v3170_v30  ;;  %2638 = vmatprep.mubr.bf16.mxu0 %v1496_v45  ;;  %v1470_v55 = vmax.f32 %v1368_v48, 0.0 }
 0x35f   : >> { %v1370_v51 = vpop.f32.mrf.mxu1  ;;  %2639 = vmatmul.mubr.bf16.gmra.mxu0 %v1497_v46 }
 0x360   : >> { %v1371_v52 = vadd.f32 %v3170_v30, %v1370_v51  ;;  %2671 = vmatpush3.bf16.msra.mxu0 %v2800_v11  ;;  %v1473_v53 = vmax.f32 %v1379_v49, 0.0 }
 0x361   : >> { %v2600_v54 = vpop.f32.mrf.mxu1  ;;  %2672 = vmatprep.subr.bf16.mxu0 %v3149_v12 }
 0x362   : >> { %v1471_v56 = vmax.f32 %v1371_v52, 0.0  ;;  %v1499_v60 = vpack.c.bf16 %v1473_v53, %v1472_v57  ;;  %v1392_v0 = vadd.f32 %v2600_v54, %v3170_v30 }
 0x363   : >> { %v1383_v58 = vpop.f32.mrf.mxu1 }
 0x364   : >> { %v1498_v59 = vpack.c.bf16 %v1471_v56, %v1470_v55  ;;  %2673 = vmatpush3.bf16.msra.mxu0 %v3149_v12  ;;  %v1384_v62 = vadd.f32 %v3170_v30, %v1383_v58  ;;  %v1476_v7 = vmax.f32 %v1392_v0, 0.0 }
 0x365   : >> { %v2601_v61 = vpop.f32.mrf.mxu1  ;;  %2674 = vmatprep.subr.bf16.mxu0 %v3155_v13 }
 0x366   : >> { %v1395_v63 = vadd.f32 %v2601_v61, %v3170_v30  ;;  %2642 = vmatprep.mubr.bf16.mxu0 %v1498_v59  ;;  %v1474_v5 = vmax.f32 %v1384_v62, 0.0 }
 0x367   : >> { %v1386_v1 = vpop.f32.mrf.mxu1  ;;  %2643 = vmatmul.mubr.bf16.gmra.mxu0 %v1499_v60 }
 0x368   : >> { %v1387_v2 = vadd.f32 %v3170_v30, %v1386_v1  ;;  %2675 = vmatpush3.bf16.msra.mxu0 %v3155_v13  ;;  %v1477_v3 = vmax.f32 %v1395_v63, 0.0 }
 0x369   : >> { %v2604_v4 = vpop.f32.mrf.mxu1  ;;  %2676 = vmatprep.subr.bf16.mxu0 %v3162_v14 }
 0x36a   : >> { %v1475_v6 = vmax.f32 %v1387_v2, 0.0  ;;  %v1501_v10 = vpack.c.bf16 %v1477_v3, %v1476_v7  ;;  %v1408_v13 = vadd.f32 %v2604_v4, %v3170_v30  ;;  %v2804_v2 = vld [vmem:[%s3368_s3 + $0x8] sm:$0xff]  }
 0x36b   : >> { %v1399_v8 = vpop.f32.mrf.mxu1  ;;  %2720 = vmatprep.subr.bf16.mxu1 %v2804_v2 }
 0x36c   : >> { %v1500_v9 = vpack.c.bf16 %v1475_v6, %v1474_v5  ;;  %2677 = vmatpush3.bf16.msra.mxu0 %v3162_v14  ;;  %v1400_v11 = vadd.f32 %v3170_v30, %v1399_v8  ;;  %v1480_v21 = vmax.f32 %v1408_v13, 0.0  ;;  %2728 = vmatpush3.bf16.msra.mxu1 %v2804_v2  ;;  %v3219_v5 = vld [vmem:[%s3369_s4 + $0x4] ss:$0 sm:$0xff] }
 0x36d   : >> { %v2605_v23 = vpop.f32.mrf.mxu1  ;;  %2678 = vmatprep.subr.bf16.mxu0 %v2804_v2 }
 0x36e   : >> { %v1411_v12 = vadd.f32 %v2605_v23, %v3170_v30  ;;  %2646 = vmatprep.mubr.bf16.mxu0 %v1500_v9  ;;  %v1478_v19 = vmax.f32 %v1400_v11, 0.0 }
 0x36f   : >> { %v1402_v15 = vpop.f32.mrf.mxu1  ;;  %2647 = vmatmul.mubr.bf16.gmra.mxu0 %v1501_v10 }
 0x370   : >> { %v1403_v16 = vadd.f32 %v3170_v30, %v1402_v15  ;;  %v1481_v17 = vmax.f32 %v1411_v12, 0.0  ;;  %2679 = vmatpush3.bf16.msra.mxu0 %v2804_v2 }
 0x371   : >> { %v2608_v18 = vpop.f32.mrf.mxu1 }
 0x372   : >> { %v1479_v20 = vmax.f32 %v1403_v16, 0.0  ;;  %v1503_v37 = vpack.c.bf16 %v1481_v17, %v1480_v21  ;;  %v1424_v27 = vadd.f32 %v2608_v18, %v3170_v30 }
 0x373   : >> { %v1415_v22 = vpop.f32.mrf.mxu1 }
 0x374   : >> { %v1502_v14 = vpack.c.bf16 %v1479_v20, %v1478_v19  ;;  %v1416_v25 = vadd.f32 %v3170_v30, %v1415_v22  ;;  %v1484_v35 = vmax.f32 %v1424_v27, 0.0 }
 0x375   : >> { %v2609_v24 = vpop.f32.mrf.mxu1 }
 0x376   : >> { %v1427_v26 = vadd.f32 %v2609_v24, %v3170_v30  ;;  %2650 = vmatprep.mubr.bf16.mxu0 %v1502_v14  ;;  %v1482_v33 = vmax.f32 %v1416_v25, 0.0 }
 0x377   : >> { %v1418_v28 = vpop.f32.mrf.mxu1  ;;  %2651 = vmatmul.mubr.bf16.gmra.mxu0 %v1503_v37 }
 0x378   : >> { %v1419_v29 = vadd.f32 %v3170_v30, %v1418_v28  ;;  %v1485_v31 = vmax.f32 %v1427_v26, 0.0 }
 0x379   : >> { %v2612_v32 = vpop.f32.mrf.mxu1 }
 0x37a   : >> { %v1483_v34 = vmax.f32 %v1419_v29, 0.0  ;;  %v1505_v39 = vpack.c.bf16 %v1485_v31, %v1484_v35  ;;  %v1440_v43 = vadd.f32 %v2612_v32, %v3170_v30 }
 0x37b   : >> { %v1431_v36 = vpop.f32.mrf.mxu1 }
 0x37c   : >> { %v1504_v38 = vpack.c.bf16 %v1483_v34, %v1482_v33  ;;  %v1432_v41 = vadd.f32 %v3170_v30, %v1431_v36  ;;  %v1488_v50 = vmax.f32 %v1440_v43, 0.0 }
 0x37d   : >> { %v2613_v40 = vpop.f32.mrf.mxu1 }
 0x37e   : >> { %v1443_v42 = vadd.f32 %v2613_v40, %v3170_v30  ;;  %2654 = vmatprep.mubr.bf16.mxu0 %v1504_v38  ;;  %v1486_v48 = vmax.f32 %v1432_v41, 0.0 }
 0x37f   : >> { %v1434_v44 = vpop.f32.mrf.mxu1  ;;  %2655 = vmatmul.mubr.bf16.gmra.mxu0 %v1505_v39 }
 0x380   : >> { %v1435_v45 = vadd.f32 %v3170_v30, %v1434_v44  ;;  %v1489_v46 = vmax.f32 %v1443_v42, 0.0 }
 0x381   : >> { %v2616_v47 = vpop.f32.mrf.mxu1 }
 0x382   : >> { %v1487_v49 = vmax.f32 %v1435_v45, 0.0  ;;  %v1507_v53 = vpack.c.bf16 %v1489_v46, %v1488_v50  ;;  %v1456_v57 = vadd.f32 %v2616_v47, %v3170_v30 }
 0x383   : >> { %v1447_v51 = vpop.f32.mrf.mxu1 }
 0x384   : >> { %v1506_v52 = vpack.c.bf16 %v1487_v49, %v1486_v48  ;;  %v1448_v55 = vadd.f32 %v3170_v30, %v1447_v51  ;;  %v1492_v63 = vmax.f32 %v1456_v57, 0.0 }
 0x385   : >> { %v2617_v54 = vpop.f32.mrf.mxu1 }
 0x386   : >> { %v1459_v56 = vadd.f32 %v2617_v54, %v3170_v30  ;;  %2658 = vmatprep.mubr.bf16.mxu0 %v1506_v52  ;;  %v1490_v61 = vmax.f32 %v1448_v55, 0.0 }
 0x387   : >> { %v1450_v58 = vpop.f32.mrf.mxu1  ;;  %2659 = vmatmul.mubr.bf16.gmra.mxu0 %v1507_v53 }
 0x388   : >> { %v1451_v59 = vadd.f32 %v3170_v30, %v1450_v58  ;;  %v1493_v60 = vmax.f32 %v1459_v56, 0.0  ;;  %v2805_v30 = vld [vmem:[%s3368_s3] sm:$0xff]  }
 0x389   : >> { %2680 = vmatprep.subr.bf16.mxu0 %v2805_v30  ;;  %2721 = vmatprep.subr.bf16.mxu1 %v2805_v30 }
 0x38a   : >> { %v1491_v62 = vmax.f32 %v1451_v59, 0.0  ;;  %v1509_v1 = vpack.c.bf16 %v1493_v60, %v1492_v63  ;;  %2681 = vmatpush3.bf16.msra.mxu0 %v2805_v30  ;;  %2729 = vmatpush3.bf16.msra.mxu1 %v2805_v30 }
 0x38c   : >> { %v1508_v0 = vpack.c.bf16 %v1491_v62, %v1490_v61 }
 0x38e   : >> { %2662 = vmatprep.mubr.bf16.mxu0 %v1508_v0 }
 0x38f   : >> { %2663 = vmatmul.mubr.bf16.gmra.mxu0 %v1509_v1 }
 0x417   : >> { %v2636_v3 = vpop.f32.mrf.mxu0 }
 0x418   : >> { %v1623_v9 = vadd.f32 %v2636_v3, %v3219_v5 }
 0x419   : >> { %v1614_v4 = vpop.f32.mrf.mxu0 }
 0x41a   : >> { %v1615_v7 = vadd.f32 %v3219_v5, %v1614_v4  ;;  %v1743_v16 = vmax.f32 %v1623_v9, 0.0 }
 0x41b   : >> { %v2637_v6 = vpop.f32.mrf.mxu0 }
 0x41c   : >> { %v1626_v8 = vadd.f32 %v2637_v6, %v3219_v5  ;;  %v1741_v13 = vmax.f32 %v1615_v7, 0.0 }
 0x41d   : >> { %v1617_v10 = vpop.f32.mrf.mxu0 }
 0x41e   : >> { %v1618_v23 = vadd.f32 %v3219_v5, %v1617_v10  ;;  %v1744_v11 = vmax.f32 %v1626_v8, 0.0 }
 0x41f   : >> { %v2640_v12 = vpop.f32.mrf.mxu0 }
 0x420   : >> { %v1742_v15 = vmax.f32 %v1618_v23, 0.0  ;;  %v1774_v19 = vpack.c.bf16 %v1744_v11, %v1743_v16  ;;  %v1639_v14 = vadd.f32 %v2640_v12, %v3219_v5 }
 0x421   : >> { %v1630_v17 = vpop.f32.mrf.mxu0 }
 0x422   : >> { %v1773_v18 = vpack.c.bf16 %v1742_v15, %v1741_v13  ;;  %v1631_v21 = vadd.f32 %v3219_v5, %v1630_v17  ;;  %v1747_v29 = vmax.f32 %v1639_v14, 0.0 }
 0x423   : >> { %v2641_v20 = vpop.f32.mrf.mxu0 }
 0x424   : >> { %v1642_v22 = vadd.f32 %v2641_v20, %v3219_v5  ;;  %2682 = vmatprep.mubr.bf16.mxu0 %v1773_v18  ;;  %v1745_v27 = vmax.f32 %v1631_v21, 0.0 }
 0x425   : >> { %v1633_v37 = vpop.f32.mrf.mxu0  ;;  %2683 = vmatmul.mubr.bf16.vlgmr.msra.gmra.mxu0 %v1774_v19 }
 0x426   : >> { %v1634_v24 = vadd.f32 %v3219_v5, %v1633_v37  ;;  %v1748_v25 = vmax.f32 %v1642_v22, 0.0 }
 0x427   : >> { %v2644_v26 = vpop.f32.mrf.mxu0 }
 0x428   : >> { %v1746_v28 = vmax.f32 %v1634_v24, 0.0  ;;  %v1776_v33 = vpack.c.bf16 %v1748_v25, %v1747_v29  ;;  %v1655_v38 = vadd.f32 %v2644_v26, %v3219_v5 }
 0x429   : >> { %v1646_v31 = vpop.f32.mrf.mxu0 }
 0x42a   : >> { %v1775_v32 = vpack.c.bf16 %v1746_v28, %v1745_v27  ;;  %v1647_v35 = vadd.f32 %v3219_v5, %v1646_v31  ;;  %v1751_v45 = vmax.f32 %v1655_v38, 0.0 }
 0x42b   : >> { %v2645_v34 = vpop.f32.mrf.mxu0 }
 0x42c   : >> { %v1658_v36 = vadd.f32 %v2645_v34, %v3219_v5  ;;  %2686 = vmatprep.mubr.bf16.mxu1 %v1775_v32  ;;  %v1749_v43 = vmax.f32 %v1647_v35, 0.0 }
 0x42d   : >> { %v1649_v39 = vpop.f32.mrf.mxu0  ;;  %2687 = vmatmul.mubr.bf16.vlgmr.msra.gmra.mxu1 %v1776_v33 }
 0x42e   : >> { %v1650_v40 = vadd.f32 %v3219_v5, %v1649_v39  ;;  %v1752_v41 = vmax.f32 %v1658_v36, 0.0 }
 0x42f   : >> { %v2648_v42 = vpop.f32.mrf.mxu0 }
 0x430   : >> { %v1750_v44 = vmax.f32 %v1650_v40, 0.0  ;;  %v1778_v48 = vpack.c.bf16 %v1752_v41, %v1751_v45  ;;  %v1671_v52 = vadd.f32 %v2648_v42, %v3219_v5 }
 0x431   : >> { %v1662_v46 = vpop.f32.mrf.mxu0 }
 0x432   : >> { %v1777_v47 = vpack.c.bf16 %v1750_v44, %v1749_v43  ;;  %v1663_v50 = vadd.f32 %v3219_v5, %v1662_v46  ;;  %v1755_v59 = vmax.f32 %v1671_v52, 0.0 }
 0x433   : >> { %v2649_v49 = vpop.f32.mrf.mxu0 }
 0x434   : >> { %v1674_v51 = vadd.f32 %v2649_v49, %v3219_v5  ;;  %2690 = vmatprep.mubr.bf16.mxu1 %v1777_v47  ;;  %v1753_v57 = vmax.f32 %v1663_v50, 0.0 }
 0x435   : >> { %v1665_v53 = vpop.f32.mrf.mxu0  ;;  %2691 = vmatmul.mubr.bf16.gmra.mxu1 %v1778_v48 }
 0x436   : >> { %v1666_v54 = vadd.f32 %v3219_v5, %v1665_v53  ;;  %v1756_v55 = vmax.f32 %v1674_v51, 0.0 }
 0x437   : >> { %v2652_v56 = vpop.f32.mrf.mxu0 }
 0x438   : >> { %v1754_v58 = vmax.f32 %v1666_v54, 0.0  ;;  %v1780_v62 = vpack.c.bf16 %v1756_v55, %v1755_v59  ;;  %v1687_v2 = vadd.f32 %v2652_v56, %v3219_v5  ;;  %v3256_v54 = vld [vmem:[%s3370_s5] ss:$0 sm:$0xff] }
 0x439   : >> { %v1678_v60 = vpop.f32.mrf.mxu0 }
 0x43a   : >> { %v1779_v61 = vpack.c.bf16 %v1754_v58, %v1753_v57  ;;  %v1679_v0 = vadd.f32 %v3219_v5, %v1678_v60  ;;  %v1759_v9 = vmax.f32 %v1687_v2, 0.0 }
 0x43b   : >> { %v2653_v63 = vpop.f32.mrf.mxu0 }
 0x43c   : >> { %v1690_v1 = vadd.f32 %v2653_v63, %v3219_v5  ;;  %2694 = vmatprep.mubr.bf16.mxu1 %v1779_v61  ;;  %v1757_v7 = vmax.f32 %v1679_v0, 0.0 }
 0x43d   : >> { %v1681_v30 = vpop.f32.mrf.mxu0  ;;  %2695 = vmatmul.mubr.bf16.gmra.mxu1 %v1780_v62 }
 0x43e   : >> { %v1682_v3 = vadd.f32 %v3219_v5, %v1681_v30  ;;  %v1760_v4 = vmax.f32 %v1690_v1, 0.0 }
 0x43f   : >> { %v2656_v6 = vpop.f32.mrf.mxu0 }
 0x440   : >> { %v1758_v8 = vmax.f32 %v1682_v3, 0.0  ;;  %v1782_v11 = vpack.c.bf16 %v1760_v4, %v1759_v9  ;;  %v1703_v16 = vadd.f32 %v2656_v6, %v3219_v5 }
 0x441   : >> { %v1694_v10 = vpop.f32.mrf.mxu0 }
 0x442   : >> { %v1781_v23 = vpack.c.bf16 %v1758_v8, %v1757_v7  ;;  %v1695_v13 = vadd.f32 %v3219_v5, %v1694_v10  ;;  %v1763_v14 = vmax.f32 %v1703_v16, 0.0 }
 0x443   : >> { %v2657_v12 = vpop.f32.mrf.mxu0 }
 0x444   : >> { %v1706_v15 = vadd.f32 %v2657_v12, %v3219_v5  ;;  %2698 = vmatprep.mubr.bf16.mxu1 %v1781_v23  ;;  %v1761_v21 = vmax.f32 %v1695_v13, 0.0 }
 0x445   : >> { %v1697_v17 = vpop.f32.mrf.mxu0  ;;  %2699 = vmatmul.mubr.bf16.gmra.mxu1 %v1782_v11 }
 0x446   : >> { %v1698_v18 = vadd.f32 %v3219_v5, %v1697_v17  ;;  %v1764_v19 = vmax.f32 %v1706_v15, 0.0 }
 0x447   : >> { %v2660_v20 = vpop.f32.mrf.mxu0 }
 0x448   : >> { %v1762_v22 = vmax.f32 %v1698_v18, 0.0  ;;  %v1784_v25 = vpack.c.bf16 %v1764_v19, %v1763_v14  ;;  %v1719_v29 = vadd.f32 %v2660_v20, %v3219_v5 }
 0x449   : >> { %v1710_v37 = vpop.f32.mrf.mxu0 }
 0x44a   : >> { %v1783_v24 = vpack.c.bf16 %v1762_v22, %v1761_v21  ;;  %v1711_v27 = vadd.f32 %v3219_v5, %v1710_v37  ;;  %v1767_v38 = vmax.f32 %v1719_v29, 0.0 }
 0x44b   : >> { %v2661_v26 = vpop.f32.mrf.mxu0 }
 0x44c   : >> { %v1722_v28 = vadd.f32 %v2661_v26, %v3219_v5  ;;  %2702 = vmatprep.mubr.bf16.mxu1 %v1783_v24  ;;  %v1765_v35 = vmax.f32 %v1711_v27, 0.0 }
 0x44d   : >> { %v1713_v31 = vpop.f32.mrf.mxu0  ;;  %2703 = vmatmul.mubr.bf16.gmra.mxu1 %v1784_v25 }
 0x44e   : >> { %v1714_v32 = vadd.f32 %v3219_v5, %v1713_v31  ;;  %v1768_v33 = vmax.f32 %v1722_v28, 0.0 }
 0x44f   : >> { %v2664_v34 = vpop.f32.mrf.mxu0 }
 0x450   : >> { %v1766_v36 = vmax.f32 %v1714_v32, 0.0  ;;  %v1786_v41 = vpack.c.bf16 %v1768_v33, %v1767_v38  ;;  %v1735_v45 = vadd.f32 %v2664_v34, %v3219_v5 }
 0x451   : >> { %v1726_v39 = vpop.f32.mrf.mxu0 }
 0x452   : >> { %v1785_v40 = vpack.c.bf16 %v1766_v36, %v1765_v35  ;;  %v1727_v43 = vadd.f32 %v3219_v5, %v1726_v39  ;;  %v1771_v51 = vmax.f32 %v1735_v45, 0.0 }
 0x453   : >> { %v2665_v42 = vpop.f32.mrf.mxu0 }
 0x454   : >> { %v1738_v44 = vadd.f32 %v2665_v42, %v3219_v5  ;;  %2706 = vmatprep.mubr.bf16.mxu1 %v1785_v40  ;;  %v1769_v49 = vmax.f32 %v1727_v43, 0.0 }
 0x455   : >> { %v1729_v46 = vpop.f32.mrf.mxu0  ;;  %2707 = vmatmul.mubr.bf16.gmra.mxu1 %v1786_v41 }
 0x456   : >> { %v1730_v47 = vadd.f32 %v3219_v5, %v1729_v46  ;;  %v1772_v48 = vmax.f32 %v1738_v44, 0.0 }
 0x458   : >> { %v1770_v50 = vmax.f32 %v1730_v47, 0.0  ;;  %v1788_v53 = vpack.c.bf16 %v1772_v48, %v1771_v51 }
 0x45a   : >> { %v1787_v52 = vpack.c.bf16 %v1770_v50, %v1769_v49 }
 0x45c   : >> { %2710 = vmatprep.mubr.bf16.mxu1 %v1787_v52 }
 0x45d   : >> { %2711 = vmatmul.mubr.bf16.gmra.mxu1 %v1788_v53 }
 0x4e5   : >> { %v2684_v55 = vpop.f32.mrf.mxu0 }
 0x4e6   : >> { %v1903_v56 = vadd.f32 %v2684_v55, %v3256_v54 }
 0x4e7   : >> { %v1894_v5 = vpop.f32.mrf.mxu0 }
 0x4e8   : >> { %v2023_v57 = vmax.f32 %v1903_v56, 0.0  ;;  %v1895_v58 = vadd.f32 %v3256_v54, %v1894_v5 }
 0x4e9   : >> { %v2685_v59 = vpop.f32.mrf.mxu0 }
 0x4ea   : >> { %2056 = vst.msk [vmem:[%s3262_s18 + $0x10] sm:$0xff] %vm416_vm0, %v2023_v57  ;;  %v2021_v60 = vmax.f32 %v1895_v58, 0.0  ;;  %v1906_v61 = vadd.f32 %v2685_v59, %v3256_v54 }
 0x4eb   : >> { %v1897_v62 = vpop.f32.mrf.mxu0 }
 0x4ec   : >> { %2054 = vst.msk [vmem:[%s3262_s18] sm:$0xff] %vm416_vm0, %v2021_v60  ;;  %v2024_v63 = vmax.f32 %v1906_v61, 0.0  ;;  %v1898_v0 = vadd.f32 %v3256_v54, %v1897_v62 }
 0x4ed   : >> { %v2688_v1 = vpop.f32.mrf.mxu1 }
 0x4ee   : >> { %2057 = vst.msk [vmem:[%s3262_s18 + $0x18] sm:$0xff] %vm416_vm0, %v2024_v63  ;;  %v2022_v2 = vmax.f32 %v1898_v0, 0.0  ;;  %v1919_v30 = vadd.f32 %v2688_v1, %v3256_v54 }
 0x4ef   : >> { %v1910_v3 = vpop.f32.mrf.mxu1 }
 0x4f0   : >> { %2055 = vst.msk [vmem:[%s3262_s18 + $0x8] sm:$0xff] %vm416_vm0, %v2022_v2  ;;  %v2027_v4 = vmax.f32 %v1919_v30, 0.0  ;;  %v1911_v6 = vadd.f32 %v3256_v54, %v1910_v3 }
 0x4f1   : >> { %v2689_v7 = vpop.f32.mrf.mxu1 }
 0x4f2   : >> { %2060 = vst.msk [vmem:[%s3262_s18 + $0x30] sm:$0xff] %vm416_vm0, %v2027_v4  ;;  %v2025_v8 = vmax.f32 %v1911_v6, 0.0  ;;  %v1922_v9 = vadd.f32 %v2689_v7, %v3256_v54 }
 0x4f3   : >> { %v1913_v10 = vpop.f32.mrf.mxu1 }
 0x4f4   : >> { %2058 = vst.msk [vmem:[%s3262_s18 + $0x20] sm:$0xff] %vm416_vm0, %v2025_v8  ;;  %v2028_v23 = vmax.f32 %v1922_v9, 0.0  ;;  %v1914_v11 = vadd.f32 %v3256_v54, %v1913_v10 }
 0x4f5   : >> { %v2692_v12 = vpop.f32.mrf.mxu1 }
 0x4f6   : >> { %2061 = vst.msk [vmem:[%s3262_s18 + $0x38] sm:$0xff] %vm416_vm0, %v2028_v23  ;;  %v2026_v13 = vmax.f32 %v1914_v11, 0.0  ;;  %v1935_v15 = vadd.f32 %v2692_v12, %v3256_v54 }
 0x4f7   : >> { %v1926_v16 = vpop.f32.mrf.mxu1 }
 0x4f8   : >> { %2059 = vst.msk [vmem:[%s3262_s18 + $0x28] sm:$0xff] %vm416_vm0, %v2026_v13  ;;  %v2031_v17 = vmax.f32 %v1935_v15, 0.0  ;;  %v1927_v18 = vadd.f32 %v3256_v54, %v1926_v16 }
 0x4f9   : >> { %v2693_v19 = vpop.f32.mrf.mxu1 }
 0x4fa   : >> { %2064 = vst.msk [vmem:[%s3262_s18 + $0x50] sm:$0xff] %vm416_vm0, %v2031_v17  ;;  %v2029_v20 = vmax.f32 %v1927_v18, 0.0  ;;  %v1938_v21 = vadd.f32 %v2693_v19, %v3256_v54 }
 0x4fb   : >> { %v1929_v22 = vpop.f32.mrf.mxu1 }
 0x4fc   : >> { %2062 = vst.msk [vmem:[%s3262_s18 + $0x40] sm:$0xff] %vm416_vm0, %v2029_v20  ;;  %v2032_v14 = vmax.f32 %v1938_v21, 0.0  ;;  %v1930_v37 = vadd.f32 %v3256_v54, %v1929_v22 }
 0x4fd   : >> { %v2696_v24 = vpop.f32.mrf.mxu1 }
 0x4fe   : >> { %2065 = vst.msk [vmem:[%s3262_s18 + $0x58] sm:$0xff] %vm416_vm0, %v2032_v14  ;;  %v2030_v25 = vmax.f32 %v1930_v37, 0.0  ;;  %v1951_v26 = vadd.f32 %v2696_v24, %v3256_v54 }
 0x4ff   : >> { %v1942_v27 = vpop.f32.mrf.mxu1 }
 0x500   : >> { %2063 = vst.msk [vmem:[%s3262_s18 + $0x48] sm:$0xff] %vm416_vm0, %v2030_v25  ;;  %v2035_v28 = vmax.f32 %v1951_v26, 0.0  ;;  %v1943_v29 = vadd.f32 %v3256_v54, %v1942_v27 }
 0x501   : >> { %v2697_v31 = vpop.f32.mrf.mxu1 }
 0x502   : >> { %2068 = vst.msk [vmem:[%s3262_s18 + $0x70] sm:$0xff] %vm416_vm0, %v2035_v28  ;;  %v2033_v32 = vmax.f32 %v1943_v29, 0.0  ;;  %v1954_v33 = vadd.f32 %v2697_v31, %v3256_v54 }
 0x503   : >> { %v1945_v34 = vpop.f32.mrf.mxu1 }
 0x504   : >> { %2066 = vst.msk [vmem:[%s3262_s18 + $0x60] sm:$0xff] %vm416_vm0, %v2033_v32  ;;  %v2036_v35 = vmax.f32 %v1954_v33, 0.0  ;;  %v1946_v36 = vadd.f32 %v3256_v54, %v1945_v34 }
 0x505   : >> { %v2700_v38 = vpop.f32.mrf.mxu1 }
 0x506   : >> { %2069 = vst.msk [vmem:[%s3262_s18 + $0x78] sm:$0xff] %vm416_vm0, %v2036_v35  ;;  %v2034_v39 = vmax.f32 %v1946_v36, 0.0  ;;  %v1967_v40 = vadd.f32 %v2700_v38, %v3256_v54 }
 0x507   : >> { %v1958_v41 = vpop.f32.mrf.mxu1 }
 0x508   : >> { %2067 = vst.msk [vmem:[%s3262_s18 + $0x68] sm:$0xff] %vm416_vm0, %v2034_v39  ;;  %v2039_v42 = vmax.f32 %v1967_v40, 0.0  ;;  %v1959_v43 = vadd.f32 %v3256_v54, %v1958_v41 }
 0x509   : >> { %v2701_v44 = vpop.f32.mrf.mxu1 }
 0x50a   : >> { %2072 = vst.msk [vmem:[%s3262_s18 + $0x90] sm:$0xff] %vm416_vm0, %v2039_v42  ;;  %v2037_v45 = vmax.f32 %v1959_v43, 0.0  ;;  %v1970_v46 = vadd.f32 %v2701_v44, %v3256_v54 }
 0x50b   : >> { %v1961_v47 = vpop.f32.mrf.mxu1 }
 0x50c   : >> { %2070 = vst.msk [vmem:[%s3262_s18 + $0x80] sm:$0xff] %vm416_vm0, %v2037_v45  ;;  %v2040_v48 = vmax.f32 %v1970_v46, 0.0  ;;  %v1962_v49 = vadd.f32 %v3256_v54, %v1961_v47 }
 0x50d   : >> { %v2704_v50 = vpop.f32.mrf.mxu1 }
 0x50e   : >> { %2073 = vst.msk [vmem:[%s3262_s18 + $0x98] sm:$0xff] %vm416_vm0, %v2040_v48  ;;  %v2038_v51 = vmax.f32 %v1962_v49, 0.0  ;;  %v1983_v52 = vadd.f32 %v2704_v50, %v3256_v54 }
 0x50f   : >> { %v1974_v53 = vpop.f32.mrf.mxu1 }
 0x510   : >> { %2071 = vst.msk [vmem:[%s3262_s18 + $0x88] sm:$0xff] %vm416_vm0, %v2038_v51  ;;  %v2043_v55 = vmax.f32 %v1983_v52, 0.0  ;;  %v1975_v56 = vadd.f32 %v3256_v54, %v1974_v53 }
 0x511   : >> { %v2705_v5 = vpop.f32.mrf.mxu1 }
 0x512   : >> { %2076 = vst.msk [vmem:[%s3262_s18 + $0xb0] sm:$0xff] %vm416_vm0, %v2043_v55  ;;  %v2041_v57 = vmax.f32 %v1975_v56, 0.0  ;;  %v1986_v58 = vadd.f32 %v2705_v5, %v3256_v54 }
 0x513   : >> { %v1977_v59 = vpop.f32.mrf.mxu1 }
 0x514   : >> { %2074 = vst.msk [vmem:[%s3262_s18 + $0xa0] sm:$0xff] %vm416_vm0, %v2041_v57  ;;  %v2044_v60 = vmax.f32 %v1986_v58, 0.0  ;;  %v1978_v61 = vadd.f32 %v3256_v54, %v1977_v59 }
 0x515   : >> { %v2708_v62 = vpop.f32.mrf.mxu1 }
 0x516   : >> { %2077 = vst.msk [vmem:[%s3262_s18 + $0xb8] sm:$0xff] %vm416_vm0, %v2044_v60  ;;  %v2042_v63 = vmax.f32 %v1978_v61, 0.0  ;;  %v1999_v0 = vadd.f32 %v2708_v62, %v3256_v54 }
 0x517   : >> { %v1990_v1 = vpop.f32.mrf.mxu1 }
 0x518   : >> { %2075 = vst.msk [vmem:[%s3262_s18 + $0xa8] sm:$0xff] %vm416_vm0, %v2042_v63  ;;  %v2047_v2 = vmax.f32 %v1999_v0, 0.0  ;;  %v1991_v30 = vadd.f32 %v3256_v54, %v1990_v1 }
 0x519   : >> { %v2709_v3 = vpop.f32.mrf.mxu1 }
 0x51a   : >> { %2080 = vst.msk [vmem:[%s3262_s18 + $0xd0] sm:$0xff] %vm416_vm0, %v2047_v2  ;;  %v2045_v4 = vmax.f32 %v1991_v30, 0.0  ;;  %v2002_v6 = vadd.f32 %v2709_v3, %v3256_v54 }
 0x51b   : >> { %v1993_v7 = vpop.f32.mrf.mxu1 }
 0x51c   : >> { %2078 = vst.msk [vmem:[%s3262_s18 + $0xc0] sm:$0xff] %vm416_vm0, %v2045_v4  ;;  %v2048_v8 = vmax.f32 %v2002_v6, 0.0  ;;  %v1994_v9 = vadd.f32 %v3256_v54, %v1993_v7 }
 0x51d   : >> { %v2712_v10 = vpop.f32.mrf.mxu1 }
 0x51e   : >> { %2081 = vst.msk [vmem:[%s3262_s18 + $0xd8] sm:$0xff] %vm416_vm0, %v2048_v8  ;;  %v2046_v23 = vmax.f32 %v1994_v9, 0.0  ;;  %v2015_v11 = vadd.f32 %v2712_v10, %v3256_v54 }
 0x51f   : >> { %v2006_v12 = vpop.f32.mrf.mxu1 }
 0x520   : >> { %2079 = vst.msk [vmem:[%s3262_s18 + $0xc8] sm:$0xff] %vm416_vm0, %v2046_v23  ;;  %v2051_v13 = vmax.f32 %v2015_v11, 0.0  ;;  %v2007_v15 = vadd.f32 %v3256_v54, %v2006_v12 }
 0x521   : >> { %v2713_v16 = vpop.f32.mrf.mxu1 }
 0x522   : >> { %2084 = vst.msk [vmem:[%s3262_s18 + $0xf0] sm:$0xff] %vm416_vm0, %v2051_v13  ;;  %v2049_v17 = vmax.f32 %v2007_v15, 0.0  ;;  %v2018_v18 = vadd.f32 %v2713_v16, %v3256_v54 }
 0x523   : >> { %v2009_v19 = vpop.f32.mrf.mxu1 }
 0x524   : >> { %2082 = vst.msk [vmem:[%s3262_s18 + $0xe0] sm:$0xff] %vm416_vm0, %v2049_v17  ;;  %v2052_v20 = vmax.f32 %v2018_v18, 0.0  ;;  %v2010_v21 = vadd.f32 %v3256_v54, %v2009_v19  ;;  %260 = sbr.rel (!%p258_p4) target bundleno = 14 (0xe), region = 86 }
 0x526   : >> { %2085 = vst.msk [vmem:[%s3262_s18 + $0xf8] sm:$0xff] %vm416_vm0, %v2052_v20  ;;  %v2050_v22 = vmax.f32 %v2010_v21, 0.0 }
 0x528   : >> { %2083 = vst.msk [vmem:[%s3262_s18 + $0xe8] sm:$0xff] %vm416_vm0, %v2050_v22 }
 0x529 PF: > { %s16_s21 = sadd.s32 1, %s2816_s21  }
 0x52a   : > { %p13_p5 = scmp.ge.s32.totalorder %s16_s21, 4  }
 0x52c   :  { %15 = sbr.rel (!%p13_p5) target bundleno = 1 (0x1), region = 97 }

</bundles_post_ra>
